<compile_context>
chip_gen: v5e
topology: v5e:2x2
jax: 0.10.0
libtpu: 0.0.40
codegen_flags: <defaults>
</compile_context>

<pallas_src>
import numpy as np
import jax
import jax.numpy as jnp
from jax import lax
from jax.experimental import pallas as pl
from jax.experimental.pallas import tpu as pltpu


# ------------------------------- kernel -------------------------------------
def pnet_kernel(x_ref, w1_ref, b1_ref, w2_ref, b2_ref, w3_ref, b3_ref, out_ref):
    f32 = jnp.float32
    bf16 = jnp.bfloat16
    x = x_ref[...]                                              # (B, 432) bf16

    # conv1 (3x3, 3->10) as one lane-dense block-Toeplitz matmul + bias + ReLU.
    # Output lane j = q*256 + (py*5 + px)*10 + co, where q indexes the 2x2
    # pool-window offset and (py, px) the pooled position.
    c1 = jnp.dot(x, w1_ref[...], preferred_element_type=f32)    # (B, 1024) f32
    c1 = jnp.maximum(c1 + b1_ref[...], 0.0)

    # max_pool2d(kernel=2, stride=2): the four window offsets occupy four
    # 256-lane-aligned blocks -> three whole-slice maxima, zero lane movement.
    pooled = jnp.maximum(jnp.maximum(c1[:, 0:256], c1[:, 256:512]),
                         jnp.maximum(c1[:, 512:768], c1[:, 768:1024]))  # (B,256)

    # conv2 (3x3, 10->16) as one Toeplitz matmul + bias + ReLU.
    c2 = jnp.dot(pooled.astype(bf16), w2_ref[...],
                 preferred_element_type=f32)                    # (B, 144) f32
    c2 = jnp.maximum(c2 + b2_ref[...], 0.0)

    # "out" conv (3x3, 16->32 -> 1x1) fused with det/bound 1x1 heads:
    # lane 0 = det logit, lanes 1..4 = bound logits, lanes 5..127 = padding.
    logits = jnp.dot(c2.astype(bf16), w3_ref[...],
                     preferred_element_type=f32) + b3_ref[...]  # (B, 128) f32

    col = lax.broadcasted_iota(jnp.int32, logits.shape, 1)
    sig = pl.reciprocal(1.0 + jnp.exp(-logits), approx=True)    # EUP slot
    res = jnp.where(col == 0, sig,
                    jnp.where(col < 5, jnp.maximum(logits, 0.0), 0.0))
    out_ref[...] = res.astype(out_ref.dtype)                    # (B, 128)


# --------------------------- host-side weight prep ---------------------------
def prepare_params(params):
    """One-time host-side prep: block-Toeplitz conv weights with the lane
    layouts baked in, fused out+head matmul, bf16 casts for the MXU."""
    w1, b1, w2, b2, w3, b3, wd, bd, wb, bb = [
        np.asarray(p, np.float32) for p in params]

    # conv1 Toeplitz (432, 1024).
    # Input lane  r = ci*144 + iy*12 + ix            (flattened NCHW row).
    # Output lane j = q*256 + (py*5 + px)*10 + co, oy = 2py + q//2, ox = 2px + q%2.
    w1t = np.zeros((432, 1024), np.float32)
    b1t = np.zeros((1, 1024), np.float32)
    for q in range(4):
        dy, dx = q // 2, q % 2
        for py in range(5):
            for px in range(5):
                oy, ox = 2 * py + dy, 2 * px + dx
                for co in range(10):
                    j = q * 256 + (py * 5 + px) * 10 + co
                    b1t[0, j] = b1[0, co]
                    for ky in range(3):
                        for kx in range(3):
                            for ci in range(3):
                                r = ci * 144 + (oy + ky) * 12 + (ox + kx)
                                w1t[r, j] = w1[ky, kx, ci, co]

    # conv2 Toeplitz (256, 144) on the pooled layout (lane = (py*5+px)*10 + ci).
    # Output lane o = (sy*3 + sx)*16 + co.
    w2t = np.zeros((256, 144), np.float32)
    b2t = np.zeros((1, 144), np.float32)
    for sy in range(3):
        for sx in range(3):
            for co in range(16):
                o = (sy * 3 + sx) * 16 + co
                b2t[0, o] = b2[0, co]
                for ky in range(3):
                    for kx in range(3):
                        for ci in range(10):
                            r = ((sy + ky) * 5 + (sx + kx)) * 10 + ci
                            w2t[r, o] = w2[ky, kx, ci, co]

    # Fuse "out" 3x3 conv with det/bound heads (no ReLU in between):
    #   logits = c2 @ (W3 @ WH) + (b3 @ WH + bH)
    w3f = w3.reshape(144, 32)                      # row = (sy*3+sx)*16 + ci
    wh = np.zeros((32, 128), np.float32)
    wh[:, 0:1] = wd
    wh[:, 1:5] = wb
    bh = np.zeros((1, 128), np.float32)
    bh[:, 0:1] = bd
    bh[:, 1:5] = bb
    w3h = w3f @ wh                                 # (144, 128)
    b3h = b3 @ wh + bh                             # (1, 128)

    bf16 = jnp.bfloat16
    return (jnp.asarray(w1t, bf16), jnp.asarray(b1t, jnp.float32),
            jnp.asarray(w2t, bf16), jnp.asarray(b2t, jnp.float32),
            jnp.asarray(w3h, bf16), jnp.asarray(b3h, jnp.float32))


# ------------------------------- wrapper -------------------------------------
def _round_up(v, m):
    return (v + m - 1) // m * m


def _full_spec(arr):
    nd = arr.ndim
    return pl.BlockSpec(arr.shape, lambda i, _nd=nd: (0,) * _nd)


@jax.jit
def pnet_forward(x_nchw, prep):
    """x_nchw: (N, 3, 12, 12) float32 -> (label (N,1,1,1), offset (N,4,1,1))."""
    w1t, b1t, w2t, b2t, w3h, b3h = prep
    n = x_nchw.shape[0]

    # Batch tile: >= 2 grid steps when possible (keeps both v7x TensorCores
    # busy on the "parallel" axis); capped at 256 so the bf16/f32
    # intermediates stay well under the 16 MiB v5e scoped-VMEM default.
    n_pad8 = _round_up(n, 8)
    if n_pad8 <= 16:
        b_tile = n_pad8
    else:
        b_tile = min(256, _round_up(n_pad8 // 2, 16))
    n_pad = _round_up(n_pad8, b_tile)

    # Layout-trivial relayout: NCHW -> (N, 432) rows (lane = c*144 + y*12 + x),
    # cast to bf16 once (halves the kernel's input DMA).
    x = x_nchw.reshape(n, 432).astype(jnp.bfloat16)
    if n_pad != n:
        x = jnp.pad(x, ((0, n_pad - n), (0, 0)))

    grid_spec = pltpu.PrefetchScalarGridSpec(
        num_scalar_prefetch=0,
        grid=(n_pad // b_tile,),
        in_specs=[
            pl.BlockSpec((b_tile, 432), lambda i: (i, 0)),
            _full_spec(w1t), _full_spec(b1t),
            _full_spec(w2t), _full_spec(b2t),
            _full_spec(w3h), _full_spec(b3h),
        ],
        out_specs=pl.BlockSpec((b_tile, 128), lambda i: (i, 0)),
    )

    out = pl.pallas_call(
        pnet_kernel,
        out_shape=jax.ShapeDtypeStruct((n_pad, 128), jnp.float32),
        grid_spec=grid_spec,
        compiler_params=pltpu.CompilerParams(
            dimension_semantics=("parallel",),
            vmem_limit_bytes=32 * 1024 * 1024),
    )(x, w1t, b1t, w2t, b2t, w3h, b3h)

    label = out[:n, 0].reshape(n, 1, 1, 1)
    offset = out[:n, 1:5].reshape(n, 4, 1, 1)
    return label, offset


# ----------------------------- pure-JAX reference ----------------------------
def ref_forward(x_nchw, params):
    w1, b1, w2, b2, w3, b3, wd, bd, wb, bb = params
    dn = ("NHWC", "HWIO", "NHWC")
    conv = lambda a, w: lax.conv_general_dilated(a, w, (1, 1), "VALID",
                                                 dimension_numbers=dn)
    x = jnp.transpose(x_nchw, (0, 2, 3, 1)).astype(jnp.float32)
    t = jax.nn.relu(conv(x, w1) + b1.reshape(1, 1, 1, -1))
    t = lax.reduce_window(t, -jnp.inf, lax.max, (1, 2, 2, 1), (1, 2, 2, 1), "VALID")
    t = jax.nn.relu(conv(t, w2) + b2.reshape(1, 1, 1, -1))
    t = conv(t, w3) + b3.reshape(1, 1, 1, -1)
    det = jax.nn.sigmoid(conv(t, wd.reshape(1, 1, 32, 1)) + bd.reshape(1, 1, 1, -1))
    off = jax.nn.relu(conv(t, wb.reshape(1, 1, 32, 4)) + bb.reshape(1, 1, 1, -1))
    return jnp.transpose(det, (0, 3, 1, 2)), jnp.transpose(off, (0, 3, 1, 2))


# ------------------------ deterministic parameter init -----------------------
def _xavier_uniform(key, shape, fan_in, fan_out):
    limit = (6.0 / (fan_in + fan_out)) ** 0.5
    return jax.random.uniform(key, shape, jnp.float32, -limit, limit)


def init_params(key):
    ks = jax.random.split(key, 5)
    # Conv weights in HWIO; biases as (1, Cout); bias init = 0.1 (weights_init).
    w1 = _xavier_uniform(ks[0], (3, 3, 3, 10), 3 * 9, 10 * 9)
    w2 = _xavier_uniform(ks[1], (3, 3, 10, 16), 10 * 9, 16 * 9)
    w3 = _xavier_uniform(ks[2], (3, 3, 16, 32), 16 * 9, 32 * 9)
    wd = _xavier_uniform(ks[3], (32, 1), 32, 1)    # det   1x1 conv as matmul
    wb = _xavier_uniform(ks[4], (32, 4), 32, 4)    # bound 1x1 conv as matmul
    b1 = jnp.full((1, 10), 0.1, jnp.float32)
    b2 = jnp.full((1, 16), 0.1, jnp.float32)
    b3 = jnp.full((1, 32), 0.1, jnp.float32)
    bd = jnp.full((1, 1), 0.1, jnp.float32)
    bb = jnp.full((1, 4), 0.1, jnp.float32)
    # TODO(synk): the `landmark` 1x1 conv head exists in __init__ but is unused
    # in forward(), so it is not instantiated here.
    return (w1, b1, w2, b2, w3, b3, wd, bd, wb, bb)


if __name__ == "__main__":
    key = jax.random.PRNGKey(0)
    k_in, k_par = jax.random.split(key)
    # matches `t = torch.rand([4, 3, 12, 12])` from the module
    x = jax.random.uniform(k_in, (4, 3, 12, 12), jnp.float32)
    params = init_params(k_par)
    prep = prepare_params(params)

    label, offset = jax.block_until_ready(pnet_forward(x, prep))
    ref_label, ref_offset = jax.block_until_ready(ref_forward(x, params))

    assert label.shape == (4, 1, 1, 1) and offset.shape == (4, 4, 1, 1)
    # bf16 MXU inputs (f32 accumulation) put errors in the few-1e-3 range vs
    # the f32 reference, so validate at 1e-2 (structural bugs are >> this).
    assert jnp.allclose(label, ref_label, atol=1e-2, rtol=1e-2)
    assert jnp.allclose(offset, ref_offset, atol=1e-2, rtol=1e-2)
    print("KERNEL_OK")
</pallas_src>

<mosaic_0001>
module attributes {stable_mosaic.version = 11 : i64} {
  func.func @pnet_kernel(%arg0: i32, %arg1: memref<8x432xbf16, #tpu.memory_space<vmem>>, %arg2: memref<432x1024xbf16, #tpu.memory_space<vmem>>, %arg3: memref<1x1024xf32, #tpu.memory_space<vmem>>, %arg4: memref<256x144xbf16, #tpu.memory_space<vmem>>, %arg5: memref<1x144xf32, #tpu.memory_space<vmem>>, %arg6: memref<144x128xbf16, #tpu.memory_space<vmem>>, %arg7: memref<1x128xf32, #tpu.memory_space<vmem>>, %arg8: memref<8x128xf32, #tpu.memory_space<vmem>>) attributes {dimension_semantics = [#tpu.dimension_semantics<parallel>], iteration_bounds = array<i64: 1>, scalar_prefetch = 0 : i64, scratch_operands = 0 : i64, tpu.core_type = #tpu.core_type<tc>, window_params = [{transform_indices = @transform_0, window_bounds = array<i64: 8, 432>}, {pipeline_mode = #tpu.pipeline_mode<synchronous>, transform_indices = @transform_1, window_bounds = array<i64: 432, 1024>}, {pipeline_mode = #tpu.pipeline_mode<synchronous>, transform_indices = @transform_2, window_bounds = array<i64: 1, 1024>}, {pipeline_mode = #tpu.pipeline_mode<synchronous>, transform_indices = @transform_3, window_bounds = array<i64: 256, 144>}, {pipeline_mode = #tpu.pipeline_mode<synchronous>, transform_indices = @transform_4, window_bounds = array<i64: 1, 144>}, {pipeline_mode = #tpu.pipeline_mode<synchronous>, transform_indices = @transform_5, window_bounds = array<i64: 144, 128>}, {pipeline_mode = #tpu.pipeline_mode<synchronous>, transform_indices = @transform_6, window_bounds = array<i64: 1, 128>}, {transform_indices = @transform_7, window_bounds = array<i64: 8, 128>}]} {
    %c0 = arith.constant 0 : index
    %c0_0 = arith.constant 0 : index
    %0 = vector.load %arg1[%c0, %c0_0] : memref<8x432xbf16, #tpu.memory_space<vmem>>, vector<8x432xbf16>
    %c0_1 = arith.constant 0 : index
    %c0_2 = arith.constant 0 : index
    %1 = vector.load %arg2[%c0_1, %c0_2] : memref<432x1024xbf16, #tpu.memory_space<vmem>>, vector<432x1024xbf16>
    %cst = arith.constant dense<0.000000e+00> : vector<8x1024xf32>
    %2 = tpu.matmul %0, %1, %cst {dimension_numbers = #tpu.dot_dimension_numbers<[1], [0], [0], [1], [0, 0, 1, 1], [], []>} : vector<8x432xbf16>, vector<432x1024xbf16>, vector<8x1024xf32> -> vector<8x1024xf32>
    %c0_3 = arith.constant 0 : index
    %c0_4 = arith.constant 0 : index
    %3 = vector.load %arg3[%c0_3, %c0_4] : memref<1x1024xf32, #tpu.memory_space<vmem>>, vector<1x1024xf32>
    %4 = vector.broadcast %3 : vector<1x1024xf32> to vector<8x1024xf32>
    %5 = arith.addf %2, %4 : vector<8x1024xf32>
    %cst_5 = arith.constant 0.000000e+00 : f32
    %6 = vector.broadcast %cst_5 : f32 to vector<8x1024xf32>
    %7 = arith.maximumf %5, %6 : vector<8x1024xf32>
    %8 = vector.extract_strided_slice %7 {offsets = [0, 0], sizes = [8, 256], strides = [1, 1]} : vector<8x1024xf32> to vector<8x256xf32>
    %9 = vector.extract_strided_slice %7 {offsets = [0, 256], sizes = [8, 256], strides = [1, 1]} : vector<8x1024xf32> to vector<8x256xf32>
    %10 = arith.maximumf %8, %9 : vector<8x256xf32>
    %11 = vector.extract_strided_slice %7 {offsets = [0, 512], sizes = [8, 256], strides = [1, 1]} : vector<8x1024xf32> to vector<8x256xf32>
    %12 = vector.extract_strided_slice %7 {offsets = [0, 768], sizes = [8, 256], strides = [1, 1]} : vector<8x1024xf32> to vector<8x256xf32>
    %13 = arith.maximumf %11, %12 : vector<8x256xf32>
    %14 = arith.maximumf %10, %13 : vector<8x256xf32>
    %15 = arith.truncf %14 : vector<8x256xf32> to vector<8x256xbf16>
    %c0_6 = arith.constant 0 : index
    %c0_7 = arith.constant 0 : index
    %16 = vector.load %arg4[%c0_6, %c0_7] : memref<256x144xbf16, #tpu.memory_space<vmem>>, vector<256x144xbf16>
    %cst_8 = arith.constant dense<0.000000e+00> : vector<8x144xf32>
    %17 = tpu.matmul %15, %16, %cst_8 {dimension_numbers = #tpu.dot_dimension_numbers<[1], [0], [0], [1], [0, 0, 1, 1], [], []>} : vector<8x256xbf16>, vector<256x144xbf16>, vector<8x144xf32> -> vector<8x144xf32>
    %c0_9 = arith.constant 0 : index
    %c0_10 = arith.constant 0 : index
    %18 = vector.load %arg5[%c0_9, %c0_10] : memref<1x144xf32, #tpu.memory_space<vmem>>, vector<1x144xf32>
    %19 = vector.broadcast %18 : vector<1x144xf32> to vector<8x144xf32>
    %20 = arith.addf %17, %19 : vector<8x144xf32>
    %cst_11 = arith.constant 0.000000e+00 : f32
    %21 = vector.broadcast %cst_11 : f32 to vector<8x144xf32>
    %22 = arith.maximumf %20, %21 : vector<8x144xf32>
    %23 = arith.truncf %22 : vector<8x144xf32> to vector<8x144xbf16>
    %c0_12 = arith.constant 0 : index
    %c0_13 = arith.constant 0 : index
    %24 = vector.load %arg6[%c0_12, %c0_13] : memref<144x128xbf16, #tpu.memory_space<vmem>>, vector<144x128xbf16>
    %cst_14 = arith.constant dense<0.000000e+00> : vector<8x128xf32>
    %25 = tpu.matmul %23, %24, %cst_14 {dimension_numbers = #tpu.dot_dimension_numbers<[1], [0], [0], [1], [0, 0, 1, 1], [], []>} : vector<8x144xbf16>, vector<144x128xbf16>, vector<8x128xf32> -> vector<8x128xf32>
    %c0_15 = arith.constant 0 : index
    %c0_16 = arith.constant 0 : index
    %26 = vector.load %arg7[%c0_15, %c0_16] : memref<1x128xf32, #tpu.memory_space<vmem>>, vector<1x128xf32>
    %27 = vector.broadcast %26 : vector<1x128xf32> to vector<8x128xf32>
    %28 = arith.addf %25, %27 : vector<8x128xf32>
    %29 = tpu.iota {dimensions = array<i32: 1>} : vector<8x128xi32>
    %cst_17 = arith.constant 0.000000e+00 : f32
    %30 = vector.broadcast %cst_17 : f32 to vector<8x128xf32>
    %31 = arith.subf %30, %28 : vector<8x128xf32>
    %32 = math.exp %31 : vector<8x128xf32>
    %cst_18 = arith.constant 1.000000e+00 : f32
    %33 = vector.broadcast %cst_18 : f32 to vector<8x128xf32>
    %34 = arith.addf %33, %32 : vector<8x128xf32>
    %35 = tpu.reciprocal %34 {approx = true} : vector<8x128xf32> -> vector<8x128xf32>
    %c0_i32 = arith.constant 0 : i32
    %36 = vector.broadcast %c0_i32 : i32 to vector<8x128xi32>
    %37 = arith.cmpi eq, %29, %36 : vector<8x128xi32>
    %c5_i32 = arith.constant 5 : i32
    %38 = vector.broadcast %c5_i32 : i32 to vector<8x128xi32>
    %39 = arith.cmpi slt, %29, %38 : vector<8x128xi32>
    %cst_19 = arith.constant 0.000000e+00 : f32
    %40 = vector.broadcast %cst_19 : f32 to vector<8x128xf32>
    %41 = arith.maximumf %28, %40 : vector<8x128xf32>
    %cst_20 = arith.constant 0.000000e+00 : f32
    %42 = vector.broadcast %cst_20 : f32 to vector<8x128xf32>
    %43 = arith.select %39, %41, %42 : vector<8x128xi1>, vector<8x128xf32>
    %44 = arith.select %37, %35, %43 : vector<8x128xi1>, vector<8x128xf32>
    %c0_21 = arith.constant 0 : index
    %c0_22 = arith.constant 0 : index
    %45 = vector.load %arg8[%c0_21, %c0_22] : memref<8x128xf32, #tpu.memory_space<vmem>>, vector<8x128xf32>
    tpu.vector_store %arg8[%c0_21, %c0_22], %44 {strides = array<i32>} : memref<8x128xf32, #tpu.memory_space<vmem>>, vector<8x128xf32>,
    return
  }
  func.func @transform_0(%arg0: i32) -> (i32, i32) {
    %c0_i32 = arith.constant 0 : i32
    %c0_i32_0 = arith.constant 0 : i32
    return %arg0, %c0_i32 : i32, i32
  }
  func.func @transform_1(%arg0: i32) -> (i32, i32) {
    %c0_i32 = arith.constant 0 : i32
    %c0_i32_0 = arith.constant 0 : i32
    %c0_i32_1 = arith.constant 0 : i32
    return %c0_i32, %c0_i32_0 : i32, i32
  }
  func.func @transform_2(%arg0: i32) -> (i32, i32) {
    %c0_i32 = arith.constant 0 : i32
    %c0_i32_0 = arith.constant 0 : i32
    %c0_i32_1 = arith.constant 0 : i32
    return %c0_i32, %c0_i32_0 : i32, i32
  }
  func.func @transform_3(%arg0: i32) -> (i32, i32) {
    %c0_i32 = arith.constant 0 : i32
    %c0_i32_0 = arith.constant 0 : i32
    %c0_i32_1 = arith.constant 0 : i32
    return %c0_i32, %c0_i32_0 : i32, i32
  }
  func.func @transform_4(%arg0: i32) -> (i32, i32) {
    %c0_i32 = arith.constant 0 : i32
    %c0_i32_0 = arith.constant 0 : i32
    %c0_i32_1 = arith.constant 0 : i32
    return %c0_i32, %c0_i32_0 : i32, i32
  }
  func.func @transform_5(%arg0: i32) -> (i32, i32) {
    %c0_i32 = arith.constant 0 : i32
    %c0_i32_0 = arith.constant 0 : i32
    %c0_i32_1 = arith.constant 0 : i32
    return %c0_i32, %c0_i32_0 : i32, i32
  }
  func.func @transform_6(%arg0: i32) -> (i32, i32) {
    %c0_i32 = arith.constant 0 : i32
    %c0_i32_0 = arith.constant 0 : i32
    %c0_i32_1 = arith.constant 0 : i32
    return %c0_i32, %c0_i32_0 : i32, i32
  }
  func.func @transform_7(%arg0: i32) -> (i32, i32) {
    %c0_i32 = arith.constant 0 : i32
    %c0_i32_0 = arith.constant 0 : i32
    return %arg0, %c0_i32 : i32, i32
  }
}

</mosaic_0001>

<bundles_post_ra>
// kernel: pnet_forward.1
= control target key start
LH: loop header
LB: loop body
LE: loop exit
PB: predicated region body
PF: predicated region fallthrough
CT: control target
= control target key end

     0   :  { %12 = vsyncpa [#allocation3], 0  ;;  %s3514_s27 = smov [#allocation2]   ;;  %s3515_s29 = smov 512   ;;  %s3895_s0 = inlined_call_operand.vmem [shape: bf16[8,432], index: 0, kind: input, shape index: {}]   ;;  %s3896_s1 = inlined_call_operand.hbm [shape: bf16[432,1024], index: 1, kind: input, shape index: {}]   ;;  %s3897_s2 = inlined_call_operand.vmem [shape: f32[1,1024], index: 2, kind: input, shape index: {}]   ;;  %s3898_s3 = inlined_call_operand.vmem [shape: bf16[256,144], index: 3, kind: input, shape index: {}]   ;;  %s3899_s4 = inlined_call_operand.vmem [shape: f32[1,144], index: 4, kind: input, shape index: {}]   ;;  %s3900_s5 = inlined_call_operand.vmem [shape: bf16[144,128], index: 5, kind: input, shape index: {}]   ;;  %s3901_s6 = inlined_call_operand.vmem [shape: f32[1,128], index: 6, kind: input, shape index: {}]   ;;  %s3902_s7 = inlined_call_operand.vmem [shape: f32[8,128], index: 7, kind: output, shape index: {}]  }
   0x1   :  { %s19_s26 = sshll.u32 %s3896_s1, 4  ;;  %s21_s28 = sshll.u32 %s3514_s27, 4  ;;  %s20_s26 = int_to_ptr.hbm [resolvable:$true] %s19_s26  ;;  %s22_s28 = int_to_ptr.vmem [resolvable:$true] %s21_s28 }
   0x2   :  { %s3516_s30 = smov 32  }
   0x3   :  { %27 = dma.hbm_to_vmem [thread:$0]  %s20_s26, 27648, %s22_s28, [#allocation3], %s3515_s29, %s3515_s29, %s3516_s30  }
   0x4   :  { %3512 = dma.done.wait [#allocation3], 27648  }
   0x5   :  { %3513 = vsyncadd [#allocation3], 4294939648  ;;  %v2412_v0 = vld [vmem:[#allocation2 + $0x1c0] sm:$0xf]  ;;  %v3279_v9 = vld [vmem:[#allocation2 + $0x1c4] sm:$0xf] }
   0x6   :  { %v3283_v1 = vld [vmem:[#allocation2 + $0x1dc] sm:$0xf0]  ;;  %v2414_v10 = vld [vmem:[#allocation2 + $0x1e0] sm:$0xf0]  ;;  %vm1372_vm0 = vcmask 392192   ;;  %vm2138_vm1 = vcmask 130048  }
   0x7   :  { %v2668_v2 = vld [vmem:[#allocation2 + $0x3c0] sm:$0xf]  ;;  %v2413_v3 = vor.u32 %v3283_v1, %v2412_v0  ;;  %v2417_v12 = vor.u32 %v3279_v9, %v2414_v10  ;;  %v3271_v20 = vld [vmem:[#allocation2 + $0x184] sm:$0xf] }
   0x8   :  { %v3347_v4 = vld [vmem:[#allocation2 + $0x3dc] sm:$0xf0]  ;;  %v2382_v22 = vld [vmem:[#allocation2 + $0x1a0] sm:$0xf0] }
   0x9   :  { %v2924_v5 = vld [vmem:[#allocation2 + $0x5c0] sm:$0xf]  ;;  %v2669_v7 = vor.u32 %v3347_v4, %v2668_v2  ;;  %1376 = vmatpush.bf16.msra.mxu0 %v2413_v3  ;;  %1428 = vmatpush.bf16.msra.mxu3 %v2417_v12  ;;  %v2385_v25 = vor.u32 %v3271_v20, %v2382_v22  ;;  %v3263_v31 = vld [vmem:[#allocation2 + $0x144] sm:$0xf] }
   0xa   :  { %v3411_v6 = vld [vmem:[#allocation2 + $0x5dc] sm:$0xf0]  ;;  %v2350_v32 = vld [vmem:[#allocation2 + $0x160] sm:$0xf0] }
   0xb   :  { %v2925_v8 = vor.u32 %v3411_v6, %v2924_v5  ;;  %v2380_v11 = vld [vmem:[#allocation2 + $0x180] sm:$0xf]  ;;  %1389 = vmatpush.bf16.msra.mxu1 %v2669_v7  ;;  %v2353_v38 = vor.u32 %v3263_v31, %v2350_v32  ;;  %v3255_v42 = vld [vmem:[#allocation2 + $0x104] sm:$0xf] }
   0xc   :  { %v3275_v13 = vld [vmem:[#allocation2 + $0x19c] sm:$0xf0]  ;;  %v2318_v43 = vld [vmem:[#allocation2 + $0x120] sm:$0xf0] }
   0xd   :  { %v2636_v14 = vld [vmem:[#allocation2 + $0x380] sm:$0xf]  ;;  %1402 = vmatpush.bf16.msra.mxu2 %v2925_v8  ;;  %v2381_v16 = vor.u32 %v3275_v13, %v2380_v11  ;;  %1429 = vmatpush.bf16.msra.mxu3 %v2385_v25  ;;  %v2321_v50 = vor.u32 %v3255_v42, %v2318_v43  ;;  %v3247_v54 = vld [vmem:[#allocation2 + $0xc4] sm:$0xf] }
   0xe   :  { %v3339_v15 = vld [vmem:[#allocation2 + $0x39c] sm:$0xf0]  ;;  %v2286_v55 = vld [vmem:[#allocation2 + $0xe0] sm:$0xf0] }
   0xf   :  { %v2637_v17 = vor.u32 %v3339_v15, %v2636_v14  ;;  %v2892_v18 = vld [vmem:[#allocation2 + $0x580] sm:$0xf]  ;;  %1377 = vmatpush.bf16.msra.mxu0 %v2381_v16  ;;  %v2289_v62 = vor.u32 %v3247_v54, %v2286_v55  ;;  %v3239_v2 = vld [vmem:[#allocation2 + $0x84] sm:$0xf] }
  0x10   :  { %v3403_v19 = vld [vmem:[#allocation2 + $0x59c] sm:$0xf0]  ;;  %v2254_v3 = vld [vmem:[#allocation2 + $0xa0] sm:$0xf0] }
  0x11   :  { %v2893_v21 = vor.u32 %v3403_v19, %v2892_v18  ;;  %v2348_v23 = vld [vmem:[#allocation2 + $0x140] sm:$0xf]  ;;  %1390 = vmatpush.bf16.msra.mxu1 %v2637_v17  ;;  %1430 = vmatpush.bf16.msra.mxu3 %v2353_v38  ;;  %v2257_v10 = vor.u32 %v3239_v2, %v2254_v3  ;;  %v3231_v14 = vld [vmem:[#allocation2 + $0x44] sm:$0xf] }
  0x12   :  { %v3267_v24 = vld [vmem:[#allocation2 + $0x15c] sm:$0xf0]  ;;  %v2222_v15 = vld [vmem:[#allocation2 + $0x60] sm:$0xf0] }
  0x13   :  { %v2604_v26 = vld [vmem:[#allocation2 + $0x340] sm:$0xf]  ;;  %v2349_v29 = vor.u32 %v3267_v24, %v2348_v23  ;;  %1403 = vmatpush.bf16.msra.mxu2 %v2893_v21  ;;  %v3343_v31 = vld [vmem:[#allocation2 + $0x3c4] sm:$0xf] }
  0x14   :  { %v3331_v27 = vld [vmem:[#allocation2 + $0x35c] sm:$0xf0]  ;;  %v2670_v32 = vld [vmem:[#allocation2 + $0x3e0] sm:$0xf0] }
  0x15   :  { %v2860_v28 = vld [vmem:[#allocation2 + $0x540] sm:$0xf]  ;;  %v2605_v33 = vor.u32 %v3331_v27, %v2604_v26  ;;  %1378 = vmatpush.bf16.msra.mxu0 %v2349_v29  ;;  %1431 = vmatpush.bf16.msra.mxu3 %v2321_v50  ;;  %v2225_v26 = vor.u32 %v3231_v14, %v2222_v15  ;;  %v3223_v27 = vld [vmem:[#allocation2 + $0x4] sm:$0xf] }
  0x16   :  { %v3395_v30 = vld [vmem:[#allocation2 + $0x55c] sm:$0xf0]  ;;  %v3335_v50 = vld [vmem:[#allocation2 + $0x384] sm:$0xf] }
  0x17   :  { %v2861_v34 = vor.u32 %v3395_v30, %v2860_v28  ;;  %v2316_v35 = vld [vmem:[#allocation2 + $0x100] sm:$0xf]  ;;  %1391 = vmatpush.bf16.msra.mxu1 %v2605_v33  ;;  %v2190_v28 = vld [vmem:[#allocation2 + $0x20] sm:$0xf0] }
  0x18   :  { %v3259_v36 = vld [vmem:[#allocation2 + $0x11c] sm:$0xf0]  ;;  %v3423_v54 = vld [vmem:[#allocation2 + $0x644] sm:$0xf] }
  0x19   :  { %v2572_v37 = vld [vmem:[#allocation2 + $0x300] sm:$0xf]  ;;  %v2317_v44 = vor.u32 %v3259_v36, %v2316_v35  ;;  %1404 = vmatpush.bf16.msra.mxu2 %v2861_v34  ;;  %1432 = vmatpush.bf16.msra.mxu3 %v2289_v62  ;;  %v3431_v34 = vld [vmem:[#allocation2 + $0x684] sm:$0xf] }
  0x1a   :  { %v3323_v39 = vld [vmem:[#allocation2 + $0x31c] sm:$0xf0]  ;;  %v3022_v35 = vld [vmem:[#allocation2 + $0x6a0] sm:$0xf0] }
  0x1b   :  { %v2828_v40 = vld [vmem:[#allocation2 + $0x500] sm:$0xf]  ;;  %v2573_v45 = vor.u32 %v3323_v39, %v2572_v37  ;;  %1379 = vmatpush.bf16.msra.mxu0 %v2317_v44  ;;  %v3566_v37 = vld [vmem:[%s3895_s0 + $0x8] sm:$0xff]  ;;  %v2193_v44 = vor.u32 %v3223_v27, %v2190_v28  ;;  %v2990_v55 = vld [vmem:[#allocation2 + $0x660] sm:$0xf0] }
  0x1c   :  { %v3387_v41 = vld [vmem:[#allocation2 + $0x51c] sm:$0xf0]  ;;  %v283_v42 = vunpack.c.l.b16 %v3566_v37  ;;  %v2606_v2 = vld [vmem:[#allocation2 + $0x360] sm:$0xf0] }
  0x1d   :  { %v2829_v46 = vor.u32 %v3387_v41, %v2828_v40  ;;  %v2284_v47 = vld [vmem:[#allocation2 + $0xc0] sm:$0xf]  ;;  %1392 = vmatpush.bf16.msra.mxu1 %v2573_v45  ;;  %1433 = vmatpush.bf16.msra.mxu3 %v2257_v10  ;;  %v2420_v40 = vld [vmem:[#allocation2 + $0x1c8] sm:$0xf] }
  0x1e   :  { %v3251_v48 = vld [vmem:[#allocation2 + $0xdc] sm:$0xf0]  ;;  %v3284_v41 = vld [vmem:[#allocation2 + $0x1e4] sm:$0xf0] }
  0x1f   :  { %v2540_v49 = vld [vmem:[#allocation2 + $0x2c0] sm:$0xf]  ;;  %v2285_v56 = vor.u32 %v3251_v48, %v2284_v47  ;;  %1405 = vmatpush.bf16.msra.mxu2 %v2829_v46  ;;  %v2673_v46 = vor.u32 %v3343_v31, %v2670_v32  ;;  %v3025_v47 = vor.u32 %v3431_v34, %v3022_v35  ;;  %v2292_v31 = vld [vmem:[#allocation2 + $0xc8] sm:$0xf]  ;;  %v3391_v34 = vld [vmem:[#allocation2 + $0x544] sm:$0xf] }
  0x20   :  { %v3315_v51 = vld [vmem:[#allocation2 + $0x2dc] sm:$0xf0]  ;;  %v2862_v35 = vld [vmem:[#allocation2 + $0x560] sm:$0xf0] }
  0x21   :  { %v2796_v52 = vld [vmem:[#allocation2 + $0x4c0] sm:$0xf]  ;;  %v2541_v57 = vor.u32 %v3315_v51, %v2540_v49  ;;  %1380 = vmatpush.bf16.msra.mxu0 %v2285_v56  ;;  %1434 = vmatpush.bf16.msra.mxu3 %v2225_v26  ;;  %v2421_v51 = vor.u32 %v3284_v41, %v2420_v40  ;;  %v2388_v56 = vld [vmem:[#allocation2 + $0x188] sm:$0xf] }
  0x22   :  { %v3379_v53 = vld [vmem:[#allocation2 + $0x4dc] sm:$0xf0] }
  0x23   :  { %v2797_v58 = vor.u32 %v3379_v53, %v2796_v52  ;;  %v2252_v59 = vld [vmem:[#allocation2 + $0x80] sm:$0xf]  ;;  %1393 = vmatpush.bf16.msra.mxu1 %v2541_v57  ;;  %v2638_v53 = vld [vmem:[#allocation2 + $0x3a0] sm:$0xf0]  ;;  %v3276_v57 = vld [vmem:[#allocation2 + $0x1a4] sm:$0xf0] }
  0x24   :  { %v3243_v60 = vld [vmem:[#allocation2 + $0x9c] sm:$0xf0]  ;;  %v2641_v62 = vor.u32 %v3335_v50, %v2638_v53  ;;  %v2389_v3 = vor.u32 %v3276_v57, %v2388_v56  ;;  %v2830_v50 = vld [vmem:[#allocation2 + $0x520] sm:$0xf0] }
  0x25   :  { %v2508_v61 = vld [vmem:[#allocation2 + $0x280] sm:$0xf]  ;;  %v2253_v4 = vor.u32 %v3243_v60, %v2252_v59  ;;  %1406 = vmatpush.bf16.msra.mxu2 %v2797_v58  ;;  %v3571_v58 = vpack.c.b16 %v283_v42, %v283_v42  ;;  %1435 = vmatpush.bf16.msra.mxu3 %v2193_v44  ;;  %v2865_v42 = vor.u32 %v3391_v34, %v2862_v35  ;;  %v2510_v44 = vld [vmem:[#allocation2 + $0x2a0] sm:$0xf0] }
  0x26   :  { %v3307_v63 = vld [vmem:[#allocation2 + $0x29c] sm:$0xf0]  ;;  %v3295_v56 = vld [vmem:[#allocation2 + $0x244] sm:$0xf] }
  0x27   :  { %v2764_v0 = vld [vmem:[#allocation2 + $0x480] sm:$0xf]  ;;  %v2509_v5 = vor.u32 %v3307_v63, %v2508_v61  ;;  %1381 = vmatpush.bf16.msra.mxu0 %v2253_v4  ;;  %v2993_v63 = vor.u32 %v3423_v54, %v2990_v55  ;;  %v3415_v4 = vld [vmem:[#allocation2 + $0x604] sm:$0xf] }
  0x28   :  { %v3371_v1 = vld [vmem:[#allocation2 + $0x49c] sm:$0xf0]  ;;  %v2478_v57 = vld [vmem:[#allocation2 + $0x260] sm:$0xf0] }
  0x29   :  { %v2765_v6 = vor.u32 %v3371_v1, %v2764_v0  ;;  %v2220_v7 = vld [vmem:[#allocation2 + $0x40] sm:$0xf]  ;;  %1394 = vmatpush.bf16.msra.mxu1 %v2509_v5  ;;  %v3327_v1 = vld [vmem:[#allocation2 + $0x344] sm:$0xf]  ;;  %1480 = vmatpush.bf16.msrb.mxu3 %v2421_v51  ;;  %v3324_v51 = vld [vmem:[#allocation2 + $0x324] sm:$0xf0] }
  0x2a   :  { %v3235_v8 = vld [vmem:[#allocation2 + $0x5c] sm:$0xf0]  ;;  %v2958_v5 = vld [vmem:[#allocation2 + $0x620] sm:$0xf0] }
  0x2b   :  { %v2476_v9 = vld [vmem:[#allocation2 + $0x240] sm:$0xf]  ;;  %v2221_v17 = vor.u32 %v3235_v8, %v2220_v7  ;;  %1407 = vmatpush.bf16.msra.mxu2 %v2765_v6  ;;  %v2356_v6 = vld [vmem:[#allocation2 + $0x148] sm:$0xf]  ;;  %v3407_v8 = vld [vmem:[#allocation2 + $0x5c4] sm:$0xf]  ;;  %v2961_v14 = vor.u32 %v3415_v4, %v2958_v5 }
  0x2c   :  { %v3299_v11 = vld [vmem:[#allocation2 + $0x25c] sm:$0xf0]  ;;  %v3268_v7 = vld [vmem:[#allocation2 + $0x164] sm:$0xf0]  ;;  %v3287_v4 = vld [vmem:[#allocation2 + $0x204] sm:$0xf] }
  0x2d   :  { %v2732_v12 = vld [vmem:[#allocation2 + $0x440] sm:$0xf]  ;;  %v2477_v21 = vor.u32 %v3299_v11, %v2476_v9  ;;  %1382 = vmatpush.bf16.msra.mxu0 %v2221_v17  ;;  %v2926_v9 = vld [vmem:[#allocation2 + $0x5e0] sm:$0xf0]  ;;  %v2676_v11 = vld [vmem:[#allocation2 + $0x3c8] sm:$0xf]  ;;  %1481 = vmatpush.bf16.msrb.mxu3 %v2389_v3  ;;  %v2357_v15 = vor.u32 %v3268_v7, %v2356_v6  ;;  %v2481_v3 = vor.u32 %v3295_v56, %v2478_v57 }
  0x2e   :  { %v3363_v13 = vld [vmem:[#allocation2 + $0x45c] sm:$0xf0]  ;;  %v3319_v17 = vld [vmem:[#allocation2 + $0x304] sm:$0xf]  ;;  %v2836_v56 = vld [vmem:[#allocation2 + $0x508] sm:$0xf] }
  0x2f   :  { %v2188_v16 = vld [vmem:[#allocation2] sm:$0xf]  ;;  %v2733_v22 = vor.u32 %v3363_v13, %v2732_v12  ;;  %1395 = vmatpush.bf16.msra.mxu1 %v2477_v21  ;;  %v3348_v12 = vld [vmem:[#allocation2 + $0x3e4] sm:$0xf0]  ;;  %v2609_v13 = vor.u32 %v3327_v1, %v2606_v2  ;;  %v2446_v7 = vld [vmem:[#allocation2 + $0x220] sm:$0xf0] }
  0x30   :  { %v3227_v18 = vld [vmem:[#allocation2 + $0x1c] sm:$0xf0]  ;;  %v3260_v21 = vld [vmem:[#allocation2 + $0x124] sm:$0xf0]  ;;  %v3351_v34 = vld [vmem:[#allocation2 + $0x404] sm:$0xf] }
  0x31   :  { %v2444_v19 = vld [vmem:[#allocation2 + $0x200] sm:$0xf]  ;;  %v2189_v33 = vor.u32 %v3227_v18, %v2188_v16  ;;  %1408 = vmatpush.bf16.msra.mxu2 %v2733_v22  ;;  %v2929_v16 = vor.u32 %v3407_v8, %v2926_v9  ;;  %v2574_v18 = vld [vmem:[#allocation2 + $0x320] sm:$0xf0]  ;;  %1482 = vmatpush.bf16.msrb.mxu3 %v2357_v15  ;;  %v2548_v1 = vld [vmem:[#allocation2 + $0x2c8] sm:$0xf] }
  0x32   :  { %v3291_v20 = vld [vmem:[#allocation2 + $0x21c] sm:$0xf0]  ;;  %v3399_v22 = vld [vmem:[#allocation2 + $0x584] sm:$0xf]  ;;  %v2577_v26 = vor.u32 %v3319_v17, %v2574_v18  ;;  %v3316_v2 = vld [vmem:[#allocation2 + $0x2e4] sm:$0xf0]  ;;  %v2449_v17 = vor.u32 %v3287_v4, %v2446_v7 }
  0x33   :  { %v2700_v23 = vld [vmem:[#allocation2 + $0x400] sm:$0xf]  ;;  %v2445_v38 = vor.u32 %v3291_v20, %v2444_v19  ;;  %1383 = vmatpush.bf16.msra.mxu0 %v2189_v33  ;;  %v2324_v19 = vld [vmem:[#allocation2 + $0x108] sm:$0xf]  ;;  %v2677_v20 = vor.u32 %v3348_v12, %v2676_v11  ;;  %v3367_v11 = vld [vmem:[#allocation2 + $0x484] sm:$0xf] }
  0x34   :  { %v3355_v24 = vld [vmem:[#allocation2 + $0x41c] sm:$0xf0]  ;;  %v2325_v27 = vor.u32 %v3260_v21, %v2324_v19  ;;  %v3252_v33 = vld [vmem:[#allocation2 + $0xe4] sm:$0xf0]  ;;  %v2766_v12 = vld [vmem:[#allocation2 + $0x4a0] sm:$0xf0] }
  0x35   :  { %v43_v25 = vld [vmem:[%s3895_s0] sm:$0xff]  ;;  %v2701_v39 = vor.u32 %v3355_v24, %v2700_v23  ;;  %1396 = vmatpush.bf16.msra.mxu1 %v2445_v38  ;;  %v2644_v24 = vld [vmem:[#allocation2 + $0x388] sm:$0xf]  ;;  %v2293_v41 = vor.u32 %v3252_v33, %v2292_v31  ;;  %v3280_v18 = vld [vmem:[#allocation2 + $0x1cc] sm:$0xf]  ;;  %v2769_v21 = vor.u32 %v3367_v11, %v2766_v12 }
  0x36   :  { %v3020_v29 = vld [vmem:[#allocation2 + $0x680] sm:$0xf]  ;;  %v282_v36 = vunpack.c.h.b16 %v43_v25  ;;  %v281_v43 = vunpack.c.l.b16 %v43_v25  ;;  %v2894_v23 = vld [vmem:[#allocation2 + $0x5a0] sm:$0xf0]  ;;  %v3340_v25 = vld [vmem:[#allocation2 + $0x3a4] sm:$0xf0]  ;;  %1483 = vmatpush.bf16.msrb.mxu3 %v2325_v27 }
  0x37   :  { %v3435_v30 = vld [vmem:[#allocation2 + $0x69c] sm:$0xf0]  ;;  %1409 = vmatpush.bf16.msra.mxu2 %v2701_v39  ;;  %1441 = vmatpush.bf16.msrb.mxu0 %v2673_v46  ;;  %v2897_v28 = vor.u32 %v3399_v22, %v2894_v23  ;;  %v2645_v32 = vor.u32 %v3340_v25, %v2644_v24  ;;  %v2612_v38 = vld [vmem:[#allocation2 + $0x348] sm:$0xf]  ;;  %v2422_v19 = vld [vmem:[#allocation2 + $0x1e8] sm:$0xf0] }
  0x38   :  { %v3021_v45 = vor.u32 %v3435_v30, %v3020_v29  ;;  %v2988_v48 = vld [vmem:[#allocation2 + $0x640] sm:$0xf]  ;;  %v3569_v52 = vpack.c.b16 %v282_v36, %v282_v36  ;;  %v3573_v59 = vpack.c.b16 %v281_v43, %v281_v43  ;;  %v3311_v29 = vld [vmem:[#allocation2 + $0x2c4] sm:$0xf]  ;;  %v284_v36 = vunpack.c.h.b16 %v3566_v37  ;;  %v3332_v39 = vld [vmem:[#allocation2 + $0x364] sm:$0xf0] }
  0x39   :  { %v3427_v49 = vld [vmem:[#allocation2 + $0x65c] sm:$0xf0]  ;;  %v2542_v30 = vld [vmem:[#allocation2 + $0x2e0] sm:$0xf0]  ;;  %v2613_v46 = vor.u32 %v3332_v39, %v2612_v38  ;;  %v2580_v37 = vld [vmem:[#allocation2 + $0x308] sm:$0xf]  ;;  %v2425_v27 = vor.u32 %v3280_v18, %v2422_v19 }
  0x3a   :  { %1420 = vmatpush.bf16.msrb.mxu1 %v3021_v45  ;;  %v2989_v60 = vor.u32 %v3427_v49, %v2988_v48  ;;  %v2956_v61 = vld [vmem:[#allocation2 + $0x600] sm:$0xf]  ;;  %1410 = vmatmul.bf16.vlgmr.msra.gmra.mxu2 %v3571_v58  ;;  %v2545_v40 = vor.u32 %v3311_v29, %v2542_v30  ;;  %v3303_v43 = vld [vmem:[#allocation2 + $0x284] sm:$0xf]  ;;  %v2260_v45 = vld [vmem:[#allocation2 + $0x88] sm:$0xf] }
  0x3b   :  { %1472 = vmatpush.bf16.msrb.mxu2 %v3025_v47  ;;  %v3419_v0 = vld [vmem:[#allocation2 + $0x61c] sm:$0xf0]  ;;  %1397 = vmatmul.bf16.vlgmr.msra.gmra.mxu1 %v3569_v52  ;;  %v3580_v47 = vpack.c.b16 %v284_v36, %v284_v36  ;;  %v3244_v48 = vld [vmem:[#allocation2 + $0xa4] sm:$0xf0]  ;;  %v3383_v49 = vld [vmem:[#allocation2 + $0x504] sm:$0xf]  ;;  %v2513_v53 = vor.u32 %v3303_v43, %v2510_v44 }
  0x3c   :  { %1384 = vmatmul.bf16.vlgmr.msra.gmra.mxu0 %v3573_v59  ;;  %v2957_v10 = vor.u32 %v3419_v0, %v2956_v61  ;;  %1436 = vmatmul.bf16.vlgmr.msra.gmra.mxu3 %v3573_v59  ;;  %v2261_v54 = vor.u32 %v3244_v48, %v2260_v45  ;;  %v2833_v55 = vor.u32 %v3383_v49, %v2830_v50  ;;  %v2798_v0 = vld [vmem:[#allocation2 + $0x4e0] sm:$0xf0]  ;;  %v2196_v8 = vld [vmem:[#allocation2 + $0x8] sm:$0xf]  ;;  %v3272_v31 = vld [vmem:[#allocation2 + $0x18c] sm:$0xf] }
  0x3d   :  { %1442 = vmatpush.bf16.msrb.mxu0 %v2641_v62  ;;  %1484 = vmatpush.bf16.msrb.mxu3 %v2293_v41  ;;  %v2581_v61 = vor.u32 %v3324_v51, %v2580_v37  ;;  %v3236_v62 = vld [vmem:[#allocation2 + $0x64] sm:$0xf0]  ;;  %v3359_v24 = vld [vmem:[#allocation2 + $0x444] sm:$0xf]  ;;  %v3264_v44 = vld [vmem:[#allocation2 + $0x14c] sm:$0xf] }
  0x3e   :  { %1421 = vmatpush.bf16.msrb.mxu1 %v2989_v60  ;;  %v2228_v60 = vld [vmem:[#allocation2 + $0x48] sm:$0xf]  ;;  %v2734_v25 = vld [vmem:[#allocation2 + $0x460] sm:$0xf0]  ;;  %v2358_v45 = vld [vmem:[#allocation2 + $0x168] sm:$0xf0] }
  0x3f   :  { %1473 = vmatpush.bf16.msrb.mxu2 %v2993_v63  ;;  %v3375_v63 = vld [vmem:[#allocation2 + $0x4c4] sm:$0xf]  ;;  %v2229_v5 = vor.u32 %v3236_v62, %v2228_v60  ;;  %v3228_v9 = vld [vmem:[#allocation2 + $0x24] sm:$0xf0]  ;;  %v2737_v33 = vor.u32 %v3359_v24, %v2734_v25  ;;  %v3408_v50 = vld [vmem:[#allocation2 + $0x5cc] sm:$0xf] }
  0x40   :  { %v2801_v6 = vor.u32 %v3375_v63, %v2798_v0  ;;  %v2932_v15 = vld [vmem:[#allocation2 + $0x5c8] sm:$0xf]  ;;  %v2702_v38 = vld [vmem:[#allocation2 + $0x420] sm:$0xf0]  ;;  %v2934_v37 = vld [vmem:[#allocation2 + $0x5e8] sm:$0xf0] }
  0x41   :  { %1443 = vmatpush.bf16.msrb.mxu0 %v2609_v13  ;;  %1485 = vmatpush.bf16.msrb.mxu3 %v2261_v54  ;;  %v2516_v13 = vld [vmem:[#allocation2 + $0x288] sm:$0xf]  ;;  %v2705_v49 = vor.u32 %v3351_v34, %v2702_v38  ;;  %v2361_v54 = vor.u32 %v3264_v44, %v2358_v45  ;;  %v3256_v60 = vld [vmem:[#allocation2 + $0x10c] sm:$0xf] }
  0x42   :  { %1422 = vmatpush.bf16.msrb.mxu1 %v2957_v10  ;;  %v2549_v10 = vor.u32 %v3316_v2, %v2548_v1  ;;  %v2900_v29 = vld [vmem:[#allocation2 + $0x588] sm:$0xf]  ;;  %v2326_v62 = vld [vmem:[#allocation2 + $0x128] sm:$0xf0] }
  0x43   :  { %1474 = vmatpush.bf16.msrb.mxu2 %v2961_v14  ;;  %v3308_v14 = vld [vmem:[#allocation2 + $0x2a4] sm:$0xf0]  ;;  %v3400_v1 = vld [vmem:[#allocation2 + $0x58c] sm:$0xf] }
  0x44   :  { %v2517_v22 = vor.u32 %v3308_v14, %v2516_v13  ;;  %v3404_v30 = vld [vmem:[#allocation2 + $0x5a4] sm:$0xf0]  ;;  %v2902_v2 = vld [vmem:[#allocation2 + $0x5a8] sm:$0xf0] }
  0x45   :  { %1444 = vmatpush.bf16.msrb.mxu0 %v2577_v26  ;;  %1486 = vmatpush.bf16.msrb.mxu3 %v2229_v5  ;;  %v2484_v26 = vld [vmem:[#allocation2 + $0x248] sm:$0xf]  ;;  %v2901_v36 = vor.u32 %v3404_v30, %v2900_v29  ;;  %v2329_v5 = vor.u32 %v3256_v60, %v2326_v62  ;;  %v3392_v13 = vld [vmem:[#allocation2 + $0x54c] sm:$0xf] }
  0x46   :  { %1454 = vmatpush.bf16.msra.mxu1 %v2929_v16  ;;  %v3412_v16 = vld [vmem:[#allocation2 + $0x5e4] sm:$0xf0]  ;;  %v2870_v14 = vld [vmem:[#allocation2 + $0x568] sm:$0xf0] }
  0x47   :  { %1493 = vmatpush.bf16.msra.mxu2 %v2677_v20  ;;  %v2197_v20 = vor.u32 %v3228_v9, %v2196_v8  ;;  %v2933_v23 = vor.u32 %v3412_v16, %v2932_v15  ;;  %v2452_v39 = vld [vmem:[#allocation2 + $0x208] sm:$0xf]  ;;  %v3248_v8 = vld [vmem:[#allocation2 + $0xcc] sm:$0xf] }
  0x48   :  { %v3396_v43 = vld [vmem:[#allocation2 + $0x564] sm:$0xf0]  ;;  %v2294_v9 = vld [vmem:[#allocation2 + $0xe8] sm:$0xf0] }
  0x49   :  { %1445 = vmatpush.bf16.msrb.mxu0 %v2545_v40  ;;  %1487 = vmatpush.bf16.msrb.mxu3 %v2197_v20  ;;  %v3292_v40 = vld [vmem:[#allocation2 + $0x224] sm:$0xf0]  ;;  %v3344_v15 = vld [vmem:[#allocation2 + $0x3cc] sm:$0xf]  ;;  %v2297_v18 = vor.u32 %v3248_v8, %v2294_v9  ;;  %v2396_v8 = vld [vmem:[#allocation2 + $0x190] sm:$0xf] }
  0x4a   :  { %1455 = vmatpush.bf16.msra.mxu1 %v2897_v28  ;;  %3051 = vmatmul.msk.bf16.vlgmr.msrb.gmra.mxu2 %vm1372_vm0, %v3580_v47  ;;  %v3300_v28 = vld [vmem:[#allocation2 + $0x264] sm:$0xf0]  ;;  %v2453_v51 = vor.u32 %v3292_v40, %v2452_v39  ;;  %v2678_v16 = vld [vmem:[#allocation2 + $0x3e8] sm:$0xf0]  ;;  %v3277_v9 = vld [vmem:[#allocation2 + $0x1ac] sm:$0xf0] }
  0x4b   :  { %1494 = vmatpush.bf16.msra.mxu2 %v2645_v32  ;;  %3050 = vmatmul.msk.bf16.vlgmr.msrb.gmra.mxu1 %vm1372_vm0, %v3580_v47  ;;  %v2390_v32 = vld [vmem:[#allocation2 + $0x1a8] sm:$0xf0]  ;;  %v2485_v35 = vor.u32 %v3300_v28, %v2484_v26  ;;  %v3436_v48 = vld [vmem:[#allocation2 + $0x6a4] sm:$0xf0] }
  0x4c   :  { %v2393_v41 = vor.u32 %v3272_v31, %v2390_v32  ;;  %1488 = vmatmul.bf16.vlgmr.msrb.gmra.mxu3 %v3573_v59  ;;  %v3388_v57 = vld [vmem:[#allocation2 + $0x524] sm:$0xf0]  ;;  %v3240_v24 = vld [vmem:[#allocation2 + $0x8c] sm:$0xf] }
  0x4d   :  { %1446 = vmatpush.bf16.msrb.mxu0 %v2513_v53  ;;  %1532 = vmatpush.bf16.msra.mxu3 %v2425_v27  ;;  %v2996_v63 = vld [vmem:[#allocation2 + $0x648] sm:$0xf]  ;;  %v2262_v25 = vld [vmem:[#allocation2 + $0xa8] sm:$0xf0] }
  0x4e   :  { %1456 = vmatpush.bf16.msra.mxu1 %v2865_v42  ;;  %v2868_v42 = vld [vmem:[#allocation2 + $0x548] sm:$0xf]  ;;  %v3384_v26 = vld [vmem:[#allocation2 + $0x50c] sm:$0xf]  ;;  %v2265_v31 = vor.u32 %v3240_v24, %v2262_v25  ;;  %v2684_v24 = vld [vmem:[#allocation2 + $0x3d0] sm:$0xf] }
  0x4f   :  { %1495 = vmatpush.bf16.msra.mxu2 %v2613_v46  ;;  %v3028_v46 = vld [vmem:[#allocation2 + $0x688] sm:$0xf]  ;;  %v2869_v53 = vor.u32 %v3396_v43, %v2868_v42  ;;  %v2838_v27 = vld [vmem:[#allocation2 + $0x528] sm:$0xf0]  ;;  %v3349_v25 = vld [vmem:[#allocation2 + $0x3ec] sm:$0xf0] }
  0x50   :  { %v3428_v0 = vld [vmem:[#allocation2 + $0x664] sm:$0xf0]  ;;  %v3336_v28 = vld [vmem:[#allocation2 + $0x38c] sm:$0xf]  ;;  %v2841_v34 = vor.u32 %v3384_v26, %v2838_v27  ;;  %v3036_v27 = vld [vmem:[#allocation2 + $0x690] sm:$0xf] }
  0x51   :  { %1447 = vmatpush.bf16.msrb.mxu0 %v2481_v3  ;;  %1533 = vmatpush.bf16.msra.mxu3 %v2393_v41  ;;  %v2837_v3 = vor.u32 %v3388_v57, %v2836_v56  ;;  %v2804_v4 = vld [vmem:[#allocation2 + $0x4c8] sm:$0xf]  ;;  %v2646_v29 = vld [vmem:[#allocation2 + $0x3a8] sm:$0xf0]  ;;  %v2428_v56 = vld [vmem:[#allocation2 + $0x1d0] sm:$0xf] }
  0x52   :  { %1457 = vmatpush.bf16.msra.mxu1 %v2833_v55  ;;  %v3029_v55 = vor.u32 %v3436_v48, %v3028_v46  ;;  %v3380_v7 = vld [vmem:[#allocation2 + $0x4e4] sm:$0xf0]  ;;  %v2230_v38 = vld [vmem:[#allocation2 + $0x68] sm:$0xf0]  ;;  %v3285_v57 = vld [vmem:[#allocation2 + $0x1ec] sm:$0xf0] }
  0x53   :  { %1496 = vmatpush.bf16.msra.mxu2 %v2581_v61  ;;  %v2937_v61 = vor.u32 %v3408_v50, %v2934_v37  ;;  %v2964_v11 = vld [vmem:[#allocation2 + $0x608] sm:$0xf]  ;;  %v3376_v39 = vld [vmem:[#allocation2 + $0x4cc] sm:$0xf] }
  0x54   :  { %v3420_v12 = vld [vmem:[#allocation2 + $0x624] sm:$0xf0]  ;;  %v2806_v40 = vld [vmem:[#allocation2 + $0x4e8] sm:$0xf0] }
  0x55   :  { %1448 = vmatpush.bf16.msrb.mxu0 %v2449_v17  ;;  %1534 = vmatpush.bf16.msra.mxu3 %v2361_v54  ;;  %v2805_v17 = vor.u32 %v3380_v7, %v2804_v4  ;;  %v2965_v19 = vor.u32 %v3420_v12, %v2964_v11  ;;  %v2772_v20 = vld [vmem:[#allocation2 + $0x488] sm:$0xf]  ;;  %v3328_v41 = vld [vmem:[#allocation2 + $0x34c] sm:$0xf]  ;;  %v2809_v50 = vor.u32 %v3376_v39, %v2806_v40  ;;  %v2652_v39 = vld [vmem:[#allocation2 + $0x390] sm:$0xf] }
  0x56   :  { %1458 = vmatpush.bf16.msra.mxu1 %v2801_v6  ;;  %v2997_v6 = vor.u32 %v3428_v0, %v2996_v63  ;;  %v2740_v32 = vld [vmem:[#allocation2 + $0x448] sm:$0xf]  ;;  %v2614_v42 = vld [vmem:[#allocation2 + $0x368] sm:$0xf0]  ;;  %v3341_v40 = vld [vmem:[#allocation2 + $0x3ac] sm:$0xf0] }
  0x57   :  { %1497 = vmatpush.bf16.msra.mxu2 %v2549_v10  ;;  %v2905_v10 = vor.u32 %v3400_v1, %v2902_v2  ;;  %v2708_v44 = vld [vmem:[#allocation2 + $0x408] sm:$0xf]  ;;  %v3224_v48 = vld [vmem:[#allocation2 + $0xc] sm:$0xf]  ;;  %v2617_v37 = vor.u32 %v3328_v41, %v2614_v42  ;;  %v2429_v2 = vor.u32 %v3285_v57, %v2428_v56  ;;  %v3004_v41 = vld [vmem:[#allocation2 + $0x650] sm:$0xf] }
  0x58   :  { %1449 = vmatmul.bf16.vlgmr.msrb.gmra.mxu0 %v3569_v52  ;;  %v3356_v46 = vld [vmem:[#allocation2 + $0x424] sm:$0xf0]  ;;  %v3030_v54 = vld [vmem:[#allocation2 + $0x6a8] sm:$0xf0]  ;;  %v3429_v42 = vld [vmem:[#allocation2 + $0x66c] sm:$0xf0] }
  0x59   :  { %1506 = vmatpush.bf16.msra.mxu0 %v2933_v23  ;;  %1535 = vmatpush.bf16.msra.mxu3 %v2329_v5  ;;  %v2681_v23 = vor.u32 %v3344_v15, %v2678_v16  ;;  %v2709_v60 = vor.u32 %v3356_v46, %v2708_v44  ;;  %v2582_v62 = vld [vmem:[#allocation2 + $0x328] sm:$0xf0]  ;;  %v2397_v15 = vor.u32 %v3277_v9, %v2396_v8  ;;  %v2300_v44 = vld [vmem:[#allocation2 + $0xd0] sm:$0xf] }
  0x5a   :  { %1459 = vmatpush.bf16.msra.mxu1 %v2769_v21  ;;  %v3372_v21 = vld [vmem:[#allocation2 + $0x4a4] sm:$0xf0]  ;;  %v3424_v4 = vld [vmem:[#allocation2 + $0x64c] sm:$0xf]  ;;  %v2653_v46 = vor.u32 %v3341_v40, %v2652_v39  ;;  %v2940_v56 = vld [vmem:[#allocation2 + $0x5d0] sm:$0xf] }
  0x5b   :  { %1498 = vmatpush.bf16.msra.mxu2 %v2517_v22  ;;  %v2873_v22 = vor.u32 %v3392_v13, %v2870_v14  ;;  %v2773_v30 = vor.u32 %v3372_v21, %v2772_v20  ;;  %v2998_v5 = vld [vmem:[#allocation2 + $0x668] sm:$0xf0]  ;;  %v2364_v20 = vld [vmem:[#allocation2 + $0x150] sm:$0xf]  ;;  %v2334_v39 = vld [vmem:[#allocation2 + $0x130] sm:$0xf0] }
  0x5c   :  { %v2742_v7 = vld [vmem:[#allocation2 + $0x468] sm:$0xf0]  ;;  %v3001_v12 = vor.u32 %v3424_v4, %v2998_v5  ;;  %v3269_v21 = vld [vmem:[#allocation2 + $0x16c] sm:$0xf0] }
  0x5d   :  { %1507 = vmatpush.bf16.msra.mxu0 %v2901_v36  ;;  %1536 = vmatpush.bf16.msra.mxu3 %v2297_v18  ;;  %v3232_v36 = vld [vmem:[#allocation2 + $0x4c] sm:$0xf]  ;;  %v3413_v57 = vld [vmem:[#allocation2 + $0x5ec] sm:$0xf0] }
  0x5e   :  { %1460 = vmatpush.bf16.msra.mxu1 %v2737_v33  ;;  %v3364_v33 = vld [vmem:[#allocation2 + $0x464] sm:$0xf0]  ;;  %v2233_v45 = vor.u32 %v3232_v36, %v2230_v38  ;;  %v2550_v11 = vld [vmem:[#allocation2 + $0x2e8] sm:$0xf0]  ;;  %v2941_v4 = vor.u32 %v3413_v57, %v2940_v56  ;;  %v2588_v5 = vld [vmem:[#allocation2 + $0x310] sm:$0xf] }
  0x5f   :  { %1499 = vmatpush.bf16.msra.mxu2 %v2485_v35  ;;  %v2649_v35 = vor.u32 %v3336_v28, %v2646_v29  ;;  %v2741_v43 = vor.u32 %v3364_v33, %v2740_v32  ;;  %v3352_v13 = vld [vmem:[#allocation2 + $0x40c] sm:$0xf]  ;;  %v3437_v28 = vld [vmem:[#allocation2 + $0x6ac] sm:$0xf0]  ;;  %v2685_v32 = vor.u32 %v3349_v25, %v2684_v24  ;;  %v2366_v24 = vld [vmem:[#allocation2 + $0x170] sm:$0xf0] }
  0x60   :  { %v2710_v16 = vld [vmem:[#allocation2 + $0x428] sm:$0xf0]  ;;  %v2332_v33 = vld [vmem:[#allocation2 + $0x110] sm:$0xf]  ;;  %v3037_v36 = vor.u32 %v3437_v28, %v3036_v27 }
  0x61   :  { %1508 = vmatpush.bf16.msra.mxu0 %v2869_v53  ;;  %1537 = vmatpush.bf16.msra.mxu3 %v2265_v31  ;;  %v3432_v53 = vld [vmem:[#allocation2 + $0x68c] sm:$0xf]  ;;  %v2713_v29 = vor.u32 %v3352_v13, %v2710_v16  ;;  %v2908_v8 = vld [vmem:[#allocation2 + $0x590] sm:$0xf] }
  0x62   :  { %1461 = vmatpush.bf16.msra.mxu1 %v2705_v49  ;;  %v2198_v49 = vld [vmem:[#allocation2 + $0x28] sm:$0xf0]  ;;  %v3033_v0 = vor.u32 %v3432_v53, %v3030_v54  ;;  %v3333_v53 = vld [vmem:[#allocation2 + $0x36c] sm:$0xf0] }
  0x63   :  { %1500 = vmatpush.bf16.msra.mxu2 %v2453_v51  ;;  %v3368_v51 = vld [vmem:[#allocation2 + $0x48c] sm:$0xf]  ;;  %v2201_v63 = vor.u32 %v3224_v48, %v2198_v49  ;;  %v3253_v48 = vld [vmem:[#allocation2 + $0xec] sm:$0xf0] }
  0x64   :  { %v2966_v18 = vld [vmem:[#allocation2 + $0x628] sm:$0xf0]  ;;  %v2972_v54 = vld [vmem:[#allocation2 + $0x610] sm:$0xf] }
  0x65   :  { %1462 = vmatmul.bf16.vlgmr.msra.gmra.mxu1 %v3571_v58  ;;  %1509 = vmatpush.bf16.msra.mxu0 %v2837_v3  ;;  %v3360_v3 = vld [vmem:[#allocation2 + $0x44c] sm:$0xf]  ;;  %v3405_v9 = vld [vmem:[#allocation2 + $0x5ac] sm:$0xf0] }
  0x66   :  { %1524 = vmatpush.bf16.msrb.mxu1 %v3029_v55  ;;  %1501 = vmatmul.bf16.vlgmr.msra.gmra.mxu2 %v3569_v52  ;;  %v2774_v55 = vld [vmem:[#allocation2 + $0x4a8] sm:$0xf0]  ;;  %v2745_v14 = vor.u32 %v3360_v3, %v2742_v7  ;;  %v2909_v16 = vor.u32 %v3405_v9, %v2908_v8  ;;  %v3229_v27 = vld [vmem:[#allocation2 + $0x2c] sm:$0xf0]  ;;  %v3321_v9 = vld [vmem:[#allocation2 + $0x314] sm:$0xf] }
  0x67   :  { %1558 = vmatpush.bf16.msrb.mxu2 %v2937_v61  ;;  %v3320_v61 = vld [vmem:[#allocation2 + $0x30c] sm:$0xf]  ;;  %1538 = vmatpush.bf16.msra.mxu3 %v2233_v45  ;;  %v2777_v1 = vor.u32 %v3368_v51, %v2774_v55  ;;  %v2620_v51 = vld [vmem:[#allocation2 + $0x350] sm:$0xf] }
  0x68   :  { %v2486_v38 = vld [vmem:[#allocation2 + $0x268] sm:$0xf0]  ;;  %v3421_v55 = vld [vmem:[#allocation2 + $0x62c] sm:$0xf0] }
  0x69   :  { %1510 = vmatpush.bf16.msra.mxu0 %v2805_v17  ;;  %v3416_v17 = vld [vmem:[#allocation2 + $0x60c] sm:$0xf]  ;;  %v2973_v3 = vor.u32 %v3421_v55, %v2972_v54  ;;  %v2524_v28 = vld [vmem:[#allocation2 + $0x290] sm:$0xf] }
  0x6a   :  { %1525 = vmatpush.bf16.msrb.mxu1 %v2997_v6  ;;  %v2585_v6 = vor.u32 %v3320_v61, %v2582_v62  ;;  %v2969_v26 = vor.u32 %v3416_v17, %v2966_v18  ;;  %v3288_v49 = vld [vmem:[#allocation2 + $0x20c] sm:$0xf]  ;;  %v3281_v61 = vld [vmem:[#allocation2 + $0x1d4] sm:$0xf]  ;;  %v2556_v17 = vld [vmem:[#allocation2 + $0x2d0] sm:$0xf] }
  0x6b   :  { %1559 = vmatpush.bf16.msrb.mxu2 %v2905_v10  ;;  %v3312_v10 = vld [vmem:[#allocation2 + $0x2cc] sm:$0xf]  ;;  %1539 = vmatpush.bf16.msra.mxu3 %v2201_v63  ;;  %v2430_v62 = vld [vmem:[#allocation2 + $0x1f0] sm:$0xf0]  ;;  %v3317_v18 = vld [vmem:[#allocation2 + $0x2ec] sm:$0xf0] }
  0x6c   :  { %v2433_v7 = vor.u32 %v3281_v61, %v2430_v62  ;;  %v2557_v25 = vor.u32 %v3317_v18, %v2556_v17  ;;  %v2460_v55 = vld [vmem:[#allocation2 + $0x210] sm:$0xf]  ;;  %v2622_v61 = vld [vmem:[#allocation2 + $0x370] sm:$0xf0] }
  0x6d   :  { %1511 = vmatpush.bf16.msra.mxu0 %v2773_v30  ;;  %v2365_v30 = vor.u32 %v3269_v21, %v2364_v20  ;;  %v2876_v20 = vld [vmem:[#allocation2 + $0x550] sm:$0xf]  ;;  %v2238_v17 = vld [vmem:[#allocation2 + $0x70] sm:$0xf0] }
  0x6e   :  { %1526 = vmatpush.bf16.msrb.mxu1 %v2965_v19  ;;  %v2553_v19 = vor.u32 %v3312_v10, %v2550_v11  ;;  %1540 = vmatmul.bf16.vlgmr.msra.gmra.mxu3 %v3573_v59  ;;  %v3273_v11 = vld [vmem:[#allocation2 + $0x194] sm:$0xf]  ;;  %v3397_v21 = vld [vmem:[#allocation2 + $0x56c] sm:$0xf0] }
  0x6f   :  { %1560 = vmatpush.bf16.msrb.mxu2 %v2873_v22  ;;  %1584 = vmatpush.bf16.msrb.mxu3 %v2429_v2  ;;  %v3304_v22 = vld [vmem:[#allocation2 + $0x28c] sm:$0xf]  ;;  %v3245_v2 = vld [vmem:[#allocation2 + $0xac] sm:$0xf0] }
  0x70   :  { %v3293_v56 = vld [vmem:[#allocation2 + $0x22c] sm:$0xf0] }
  0x71   :  { %1512 = vmatpush.bf16.msra.mxu0 %v2741_v43  ;;  %v2780_v62 = vld [vmem:[#allocation2 + $0x490] sm:$0xf] }
  0x72   :  { %1545 = vmatpush.bf16.msra.mxu1 %v2681_v23  ;;  %v2518_v23 = vld [vmem:[#allocation2 + $0x2a8] sm:$0xf0] }
  0x73   :  { %1561 = vmatpush.bf16.msrb.mxu2 %v2841_v34  ;;  %1585 = vmatpush.bf16.msrb.mxu3 %v2397_v15  ;;  %v2521_v31 = vor.u32 %v3304_v22, %v2518_v23  ;;  %v3261_v34 = vld [vmem:[#allocation2 + $0x12c] sm:$0xf0]  ;;  %v3265_v23 = vld [vmem:[#allocation2 + $0x154] sm:$0xf] }
  0x74   :  { %v2333_v43 = vor.u32 %v3261_v34, %v2332_v33  ;;  %v3237_v15 = vld [vmem:[#allocation2 + $0x6c] sm:$0xf0]  ;;  %v2369_v33 = vor.u32 %v3265_v23, %v2366_v24 }
  0x75   :  { %3052 = vmatmul.msk.bf16.vlgmr.msrb.gmra.mxu1 %vm1372_vm0, %v3580_v47  ;;  %1513 = vmatpush.bf16.msra.mxu0 %v2709_v60  ;;  %v2301_v60 = vor.u32 %v3253_v48, %v2300_v44  ;;  %v2844_v34 = vld [vmem:[#allocation2 + $0x510] sm:$0xf] }
  0x76   :  { %1546 = vmatpush.bf16.msra.mxu1 %v2649_v35  ;;  %v3296_v35 = vld [vmem:[#allocation2 + $0x24c] sm:$0xf]  ;;  %v3301_v44 = vld [vmem:[#allocation2 + $0x26c] sm:$0xf0] }
  0x77   :  { %1562 = vmatpush.bf16.msrb.mxu2 %v2809_v50  ;;  %1586 = vmatpush.bf16.msrb.mxu3 %v2365_v30  ;;  %v2489_v45 = vor.u32 %v3296_v35, %v2486_v38  ;;  %v2454_v50 = vld [vmem:[#allocation2 + $0x228] sm:$0xf0]  ;;  %v3309_v30 = vld [vmem:[#allocation2 + $0x2ac] sm:$0xf0]  ;;  %v3257_v38 = vld [vmem:[#allocation2 + $0x114] sm:$0xf] }
  0x78   :  { %1514 = vmatmul.bf16.vlgmr.msra.gmra.mxu0 %v3571_v58  ;;  %v2457_v63 = vor.u32 %v3288_v49, %v2454_v50  ;;  %v3389_v35 = vld [vmem:[#allocation2 + $0x52c] sm:$0xf0]  ;;  %v2525_v40 = vor.u32 %v3309_v30, %v2524_v28  ;;  %v2337_v48 = vor.u32 %v3257_v38, %v2334_v39  ;;  %v2878_v28 = vld [vmem:[#allocation2 + $0x570] sm:$0xf0] }
  0x79   :  { %1576 = vmatpush.bf16.msrb.mxu0 %v3033_v0  ;;  %v2621_v0 = vor.u32 %v3333_v53, %v2620_v51  ;;  %v2812_v49 = vld [vmem:[#allocation2 + $0x4d0] sm:$0xf]  ;;  %v2302_v51 = vld [vmem:[#allocation2 + $0xf0] sm:$0xf0] }
  0x7a   :  { %1547 = vmatpush.bf16.msra.mxu1 %v2617_v37  ;;  %v3005_v37 = vor.u32 %v3429_v42, %v3004_v41  ;;  %v2492_v42 = vld [vmem:[#allocation2 + $0x250] sm:$0xf]  ;;  %v3433_v30 = vld [vmem:[#allocation2 + $0x694] sm:$0xf] }
  0x7b   :  { %1563 = vmatpush.bf16.msrb.mxu2 %v2777_v1  ;;  %1587 = vmatpush.bf16.msrb.mxu3 %v2333_v43  ;;  %v2268_v1 = vld [vmem:[#allocation2 + $0x90] sm:$0xf]  ;;  %v2845_v43 = vor.u32 %v3389_v35, %v2844_v34  ;;  %v2493_v53 = vor.u32 %v3301_v44, %v2492_v42  ;;  %v3350_v34 = vld [vmem:[#allocation2 + $0x3f4] sm:$0xf0]  ;;  %v3305_v38 = vld [vmem:[#allocation2 + $0x294] sm:$0xf] }
  0x7c   :  { %v2269_v10 = vor.u32 %v3245_v2, %v2268_v1  ;;  %v3381_v50 = vld [vmem:[#allocation2 + $0x4ec] sm:$0xf0]  ;;  %v3409_v1 = vld [vmem:[#allocation2 + $0x5d4] sm:$0xf] }
  0x7d   :  { %1577 = vmatpush.bf16.msrb.mxu0 %v3001_v12  ;;  %v2398_v12 = vld [vmem:[#allocation2 + $0x1b0] sm:$0xf0]  ;;  %v2813_v57 = vor.u32 %v3381_v50, %v2812_v49  ;;  %v2716_v23 = vld [vmem:[#allocation2 + $0x410] sm:$0xf]  ;;  %v2660_v49 = vld [vmem:[#allocation2 + $0x398] sm:$0xf] }
  0x7e   :  { %1548 = vmatpush.bf16.msra.mxu1 %v2585_v6  ;;  %v3325_v6 = vld [vmem:[#allocation2 + $0x32c] sm:$0xf0]  ;;  %v2942_v2 = vld [vmem:[#allocation2 + $0x5f0] sm:$0xf0]  ;;  %v3342_v50 = vld [vmem:[#allocation2 + $0x3b4] sm:$0xf0] }
  0x7f   :  { %1564 = vmatpush.bf16.msrb.mxu2 %v2745_v14  ;;  %1588 = vmatpush.bf16.msrb.mxu3 %v2301_v60  ;;  %v2589_v13 = vor.u32 %v3325_v6, %v2588_v5  ;;  %v2236_v14 = vld [vmem:[#allocation2 + $0x50] sm:$0xf]  ;;  %v3329_v60 = vld [vmem:[#allocation2 + $0x354] sm:$0xf]  ;;  %v2461_v5 = vor.u32 %v3293_v56, %v2460_v55  ;;  %v2945_v8 = vor.u32 %v3409_v1, %v2942_v2  ;;  %v2436_v1 = vld [vmem:[#allocation2 + $0x1d8] sm:$0xf] }
  0x80   :  { %v2237_v22 = vor.u32 %v3237_v15, %v2236_v14  ;;  %v2625_v6 = vor.u32 %v3329_v60, %v2622_v61  ;;  %v3401_v14 = vld [vmem:[#allocation2 + $0x594] sm:$0xf]  ;;  %v3357_v24 = vld [vmem:[#allocation2 + $0x42c] sm:$0xf0]  ;;  %v3286_v2 = vld [vmem:[#allocation2 + $0x1f4] sm:$0xf0] }
  0x81   :  { %1578 = vmatpush.bf16.msrb.mxu0 %v2969_v26  ;;  %v2204_v26 = vld [vmem:[#allocation2 + $0x10] sm:$0xf]  ;;  %v2910_v15 = vld [vmem:[#allocation2 + $0x5b0] sm:$0xf0]  ;;  %v2717_v35 = vor.u32 %v3357_v24, %v2716_v23  ;;  %v3406_v23 = vld [vmem:[#allocation2 + $0x5b4] sm:$0xf0] }
  0x82   :  { %1549 = vmatpush.bf16.msra.mxu1 %v2553_v19  ;;  %v2401_v19 = vor.u32 %v3273_v11, %v2398_v12  ;;  %v2748_v11 = vld [vmem:[#allocation2 + $0x450] sm:$0xf]  ;;  %v2526_v39 = vld [vmem:[#allocation2 + $0x2b0] sm:$0xf0] }
  0x83   :  { %1565 = vmatpush.bf16.msrb.mxu2 %v2713_v29  ;;  %1589 = vmatpush.bf16.msrb.mxu3 %v2269_v10  ;;  %v2877_v29 = vor.u32 %v3397_v21, %v2876_v20  ;;  %v2590_v10 = vld [vmem:[#allocation2 + $0x330] sm:$0xf0]  ;;  %v2913_v21 = vor.u32 %v3401_v14, %v2910_v15  ;;  %v3326_v15 = vld [vmem:[#allocation2 + $0x334] sm:$0xf0] }
  0x84   :  { %v2593_v18 = vor.u32 %v3321_v9, %v2590_v10  ;;  %v3385_v42 = vld [vmem:[#allocation2 + $0x514] sm:$0xf]  ;;  %v2948_v9 = vld [vmem:[#allocation2 + $0x5d8] sm:$0xf] }
  0x85   :  { %1597 = vmatpush.bf16.msra.mxu0 %v2685_v32  ;;  %v2686_v32 = vld [vmem:[#allocation2 + $0x3f0] sm:$0xf0]  ;;  %v3414_v10 = vld [vmem:[#allocation2 + $0x5f4] sm:$0xf0] }
  0x86   :  { %1550 = vmatpush.bf16.msra.mxu1 %v2521_v31  ;;  %1566 = vmatmul.bf16.vlgmr.msrb.gmra.mxu2 %v3571_v58  ;;  %v3345_v31 = vld [vmem:[#allocation2 + $0x3d4] sm:$0xf] }
  0x87   :  { %1628 = vmatpush.bf16.msra.mxu2 %v3037_v36  ;;  %1590 = vmatpush.bf16.msrb.mxu3 %v2237_v22  ;;  %v2205_v36 = vor.u32 %v3229_v27, %v2204_v26  ;;  %v2689_v41 = vor.u32 %v3345_v31, %v2686_v32  ;;  %v2558_v22 = vld [vmem:[#allocation2 + $0x2f0] sm:$0xf0] }
  0x88   :  { %3053 = vmatmul.msk.bf16.vlgmr.msrb.gmra.mxu0 %vm1372_vm0, %v3580_v47  ;;  %v3225_v26 = vld [vmem:[#allocation2 + $0x14] sm:$0xf] }
  0x89   :  { %1598 = vmatpush.bf16.msra.mxu0 %v2653_v46  ;;  %v2654_v46 = vld [vmem:[#allocation2 + $0x3b0] sm:$0xf0] }
  0x8a   :  { %1551 = vmatpush.bf16.msra.mxu1 %v2489_v45  ;;  %v3337_v45 = vld [vmem:[#allocation2 + $0x394] sm:$0xf] }
  0x8b   :  { %1629 = vmatpush.bf16.msra.mxu2 %v3005_v37  ;;  %1591 = vmatpush.bf16.msrb.mxu3 %v2205_v36  ;;  %v3249_v37 = vld [vmem:[#allocation2 + $0xd4] sm:$0xf]  ;;  %v2657_v54 = vor.u32 %v3337_v45, %v2654_v46 }
  0x8c   :  { %v3393_v27 = vld [vmem:[#allocation2 + $0x554] sm:$0xf] }
  0x8d   :  { %1599 = vmatpush.bf16.msra.mxu0 %v2621_v0  ;;  %v3373_v0 = vld [vmem:[#allocation2 + $0x4ac] sm:$0xf0]  ;;  %v3038_v31 = vld [vmem:[#allocation2 + $0x6b0] sm:$0xf0]  ;;  %v2881_v36 = vor.u32 %v3393_v27, %v2878_v28  ;;  %v3318_v27 = vld [vmem:[#allocation2 + $0x2f4] sm:$0xf0] }
  0x8e   :  { %1552 = vmatpush.bf16.msra.mxu1 %v2457_v63  ;;  %v2305_v63 = vor.u32 %v3249_v37, %v2302_v51  ;;  %1592 = vmatmul.bf16.vlgmr.msrb.gmra.mxu3 %v3573_v59  ;;  %v3425_v45 = vld [vmem:[#allocation2 + $0x654] sm:$0xf]  ;;  %v2372_v28 = vld [vmem:[#allocation2 + $0x158] sm:$0xf] }
  0x8f   :  { %1630 = vmatpush.bf16.msra.mxu2 %v2973_v3  ;;  %1649 = vmatpush.bf16.msra.mxu3 %v2689_v41  ;;  %v3241_v3 = vld [vmem:[#allocation2 + $0x94] sm:$0xf]  ;;  %v3041_v41 = vor.u32 %v3433_v30, %v3038_v31 }
  0x90   :  { %v3006_v46 = vld [vmem:[#allocation2 + $0x670] sm:$0xf0] }
  0x91   :  { %1553 = vmatmul.bf16.vlgmr.msra.gmra.mxu1 %v3569_v52  ;;  %1600 = vmatpush.bf16.msra.mxu0 %v2589_v13  ;;  %v3365_v13 = vld [vmem:[#allocation2 + $0x46c] sm:$0xf0]  ;;  %v3297_v51 = vld [vmem:[#allocation2 + $0x254] sm:$0xf] }
  0x92   :  { %1610 = vmatpush.bf16.msrb.mxu1 %v2941_v4  ;;  %v2270_v4 = vld [vmem:[#allocation2 + $0xb0] sm:$0xf0]  ;;  %v2749_v20 = vor.u32 %v3365_v13, %v2748_v11  ;;  %v2596_v13 = vld [vmem:[#allocation2 + $0x318] sm:$0xf] }
  0x93   :  { %1636 = vmatpush.bf16.msrb.mxu2 %v2433_v7  ;;  %1650 = vmatpush.bf16.msra.mxu3 %v2657_v54  ;;  %v2781_v7 = vor.u32 %v3373_v0, %v2780_v62  ;;  %v2273_v12 = vor.u32 %v3241_v3, %v2270_v4  ;;  %v3009_v54 = vor.u32 %v3425_v45, %v3006_v46  ;;  %v3377_v55 = vld [vmem:[#allocation2 + $0x4d4] sm:$0xf]  ;;  %v2628_v62 = vld [vmem:[#allocation2 + $0x358] sm:$0xf]  ;;  %v3608_v45 = vld [vmem:[%s3897_s2] sm:$0xff] }
  0x94   :  { %v2814_v56 = vld [vmem:[#allocation2 + $0x4f0] sm:$0xf0]  ;;  %v3334_v0 = vld [vmem:[#allocation2 + $0x374] sm:$0xf0]  ;;  %v2597_v24 = vor.u32 %v3326_v15, %v2596_v13 }
  0x95   :  { %1601 = vmatpush.bf16.msra.mxu0 %v2557_v25  ;;  %v3417_v60 = vld [vmem:[#allocation2 + $0x614] sm:$0xf]  ;;  %v2817_v3 = vor.u32 %v3377_v55, %v2814_v56  ;;  %v2629_v11 = vor.u32 %v3334_v0, %v2628_v62  ;;  %v3012_v55 = vld [vmem:[#allocation2 + $0x658] sm:$0xf] }
  0x96   :  { %1611 = vmatpush.bf16.msrb.mxu1 %v2909_v16  ;;  %3054 = vmatmul.msk.bf16.vlgmr.msra.gmra.mxu2 %vm1372_vm0, %v3580_v47  ;;  %v3233_v16 = vld [vmem:[#allocation2 + $0x54] sm:$0xf]  ;;  %v3430_v56 = vld [vmem:[#allocation2 + $0x674] sm:$0xf0] }
  0x97   :  { %1637 = vmatpush.bf16.msrb.mxu2 %v2401_v19  ;;  %1651 = vmatpush.bf16.msra.mxu3 %v2625_v6  ;;  %v3313_v19 = vld [vmem:[#allocation2 + $0x2d4] sm:$0xf]  ;;  %v2241_v25 = vor.u32 %v3233_v16, %v2238_v17  ;;  %v2404_v16 = vld [vmem:[#allocation2 + $0x198] sm:$0xf] }
  0x98   :  { %v2561_v32 = vor.u32 %v3313_v19, %v2558_v22  ;;  %v2974_v61 = vld [vmem:[#allocation2 + $0x630] sm:$0xf0]  ;;  %v3278_v17 = vld [vmem:[#allocation2 + $0x1b4] sm:$0xf0]  ;;  %v2949_v19 = vor.u32 %v3414_v10, %v2948_v9 }
  0x99   :  { %1602 = vmatpush.bf16.msra.mxu0 %v2525_v40  ;;  %v3289_v4 = vld [vmem:[#allocation2 + $0x214] sm:$0xf]  ;;  %v2916_v22 = vld [vmem:[#allocation2 + $0x598] sm:$0xf] }
  0x9a   :  { %1612 = vmatpush.bf16.msrb.mxu1 %v2877_v29  ;;  %v2206_v29 = vld [vmem:[#allocation2 + $0x30] sm:$0xf0]  ;;  %v2917_v31 = vor.u32 %v3406_v23, %v2916_v22  ;;  %v3254_v62 = vld [vmem:[#allocation2 + $0xf4] sm:$0xf0] }
  0x9b   :  { %1638 = vmatpush.bf16.msrb.mxu2 %v2369_v33  ;;  %1652 = vmatpush.bf16.msra.mxu3 %v2593_v18  ;;  %v2692_v33 = vld [vmem:[#allocation2 + $0x3d8] sm:$0xf]  ;;  %v2209_v40 = vor.u32 %v3225_v26, %v2206_v29  ;;  %v3369_v6 = vld [vmem:[#allocation2 + $0x494] sm:$0xf] }
  0x9c   :  { %v2693_v44 = vor.u32 %v3350_v34, %v2692_v33  ;;  %v2564_v26 = vld [vmem:[#allocation2 + $0x2d8] sm:$0xf]  ;;  %v2718_v33 = vld [vmem:[#allocation2 + $0x430] sm:$0xf0] }
  0x9d   :  { %1603 = vmatpush.bf16.msra.mxu0 %v2493_v53  ;;  %v2494_v53 = vld [vmem:[#allocation2 + $0x270] sm:$0xf0]  ;;  %v3270_v29 = vld [vmem:[#allocation2 + $0x174] sm:$0xf0] }
  0x9e   :  { %1613 = vmatpush.bf16.msrb.mxu1 %v2845_v43  ;;  %v2846_v43 = vld [vmem:[#allocation2 + $0x530] sm:$0xf0]  ;;  %v2884_v34 = vld [vmem:[#allocation2 + $0x558] sm:$0xf] }
  0x9f   :  { %1639 = vmatpush.bf16.msrb.mxu2 %v2337_v48  ;;  %1653 = vmatpush.bf16.msra.mxu3 %v2561_v32  ;;  %v2529_v48 = vor.u32 %v3305_v38, %v2526_v39  ;;  %v2849_v37 = vor.u32 %v3385_v42, %v2846_v43  ;;  %v3353_v32 = vld [vmem:[#allocation2 + $0x414] sm:$0xf]  ;;  %v2565_v38 = vor.u32 %v3318_v27, %v2564_v26  ;;  %v3438_v42 = vld [vmem:[#allocation2 + $0x6b4] sm:$0xf0] }
  0xa0   :  { %v2373_v39 = vor.u32 %v3270_v29, %v2372_v28  ;;  %v2340_v43 = vld [vmem:[#allocation2 + $0x118] sm:$0xf]  ;;  %v2721_v46 = vor.u32 %v3353_v32, %v2718_v33 }
  0xa1   :  { %1604 = vmatpush.bf16.msra.mxu0 %v2461_v5  ;;  %v2462_v5 = vld [vmem:[#allocation2 + $0x230] sm:$0xf0]  ;;  %v3294_v9 = vld [vmem:[#allocation2 + $0x234] sm:$0xf0] }
  0xa2   :  { %1614 = vmatpush.bf16.msrb.mxu1 %v2813_v57  ;;  %v2661_v57 = vor.u32 %v3342_v50, %v2660_v49  ;;  %v2465_v14 = vor.u32 %v3289_v4, %v2462_v5  ;;  %v2852_v50 = vld [vmem:[#allocation2 + $0x518] sm:$0xf] }
  0xa3   :  { %1640 = vmatpush.bf16.msrb.mxu2 %v2305_v63  ;;  %1654 = vmatpush.bf16.msra.mxu3 %v2529_v48  ;;  %v2497_v63 = vor.u32 %v3297_v51, %v2494_v53  ;;  %v2500_v51 = vld [vmem:[#allocation2 + $0x258] sm:$0xf] }
  0xa4   :  { %1605 = vmatmul.bf16.vlgmr.msra.gmra.mxu0 %v3569_v52  ;;  %v3382_v4 = vld [vmem:[#allocation2 + $0x4f4] sm:$0xf0] }
  0xa5   :  { %1662 = vmatpush.bf16.msrb.mxu0 %v2945_v8  ;;  %v2782_v8 = vld [vmem:[#allocation2 + $0x4b0] sm:$0xf0]  ;;  %v2468_v5 = vld [vmem:[#allocation2 + $0x218] sm:$0xf] }
  0xa6   :  { %1615 = vmatpush.bf16.msrb.mxu1 %v2781_v7  ;;  %v2977_v7 = vor.u32 %v3417_v60, %v2974_v61  ;;  %v2785_v18 = vor.u32 %v3369_v6, %v2782_v8  ;;  %v3302_v60 = vld [vmem:[#allocation2 + $0x274] sm:$0xf0]  ;;  %v2469_v23 = vor.u32 %v3294_v9, %v2468_v5  ;;  %v2342_v5 = vld [vmem:[#allocation2 + $0x138] sm:$0xf0] }
  0xa7   :  { %1641 = vmatpush.bf16.msrb.mxu2 %v2273_v12  ;;  %v2437_v12 = vor.u32 %v3286_v2, %v2436_v1  ;;  %1655 = vmatpush.bf16.msra.mxu3 %v2497_v63  ;;  %v2308_v61 = vld [vmem:[#allocation2 + $0xd8] sm:$0xf]  ;;  %v3013_v1 = vor.u32 %v3430_v56, %v3012_v55  ;;  %v2501_v6 = vor.u32 %v3302_v60, %v2500_v51  ;;  %v3394_v51 = vld [vmem:[#allocation2 + $0x55c] sm:$0xf] }
  0xa8   :  { %v2980_v10 = vld [vmem:[#allocation2 + $0x618] sm:$0xf]  ;;  %v2694_v55 = vld [vmem:[#allocation2 + $0x3f8] sm:$0xf0] }
  0xa9   :  { %1663 = vmatpush.bf16.msrb.mxu0 %v2913_v21  ;;  %v2750_v21 = vld [vmem:[#allocation2 + $0x470] sm:$0xf0]  ;;  %v3246_v13 = vld [vmem:[#allocation2 + $0xb4] sm:$0xf0] }
  0xaa   :  { %1616 = vmatpush.bf16.msrb.mxu1 %v2749_v20  ;;  %v3361_v20 = vld [vmem:[#allocation2 + $0x454] sm:$0xf]  ;;  %v3374_v22 = vld [vmem:[#allocation2 + $0x4b4] sm:$0xf0] }
  0xab   :  { %1642 = vmatpush.bf16.msrb.mxu2 %v2241_v25  ;;  %v2405_v25 = vor.u32 %v3278_v17, %v2404_v16  ;;  %1656 = vmatpush.bf16.msra.mxu3 %v2465_v14  ;;  %v2753_v30 = vor.u32 %v3361_v20, %v2750_v21  ;;  %v3282_v14 = vld [vmem:[#allocation2 + $0x1dc] sm:$0xf]  ;;  %v2788_v21 = vld [vmem:[#allocation2 + $0x498] sm:$0xf] }
  0xac   :  { %v2438_v16 = vld [vmem:[#allocation2 + $0x1f8] sm:$0xf0]  ;;  %v2244_v28 = vld [vmem:[#allocation2 + $0x58] sm:$0xf]  ;;  %v2789_v33 = vor.u32 %v3374_v22, %v2788_v21 }
  0xad   :  { %1664 = vmatpush.bf16.msrb.mxu0 %v2881_v36  ;;  %v2532_v36 = vld [vmem:[#allocation2 + $0x298] sm:$0xf]  ;;  %v3410_v17 = vld [vmem:[#allocation2 + $0x5dc] sm:$0xf] }
  0xae   :  { %1617 = vmatpush.bf16.msrb.mxu1 %v2717_v35  ;;  %v3398_v35 = vld [vmem:[#allocation2 + $0x574] sm:$0xf0]  ;;  %1657 = vmatmul.bf16.vlgmr.msra.gmra.mxu3 %v3569_v52  ;;  %v3378_v21 = vld [vmem:[#allocation2 + $0x4dc] sm:$0xf] }
  0xaf   :  { %1643 = vmatpush.bf16.msrb.mxu2 %v2209_v40  ;;  %1714 = vmatpush.bf16.msrb.mxu3 %v2949_v19  ;;  %v3310_v40 = vld [vmem:[#allocation2 + $0x2b4] sm:$0xf0]  ;;  %v2885_v48 = vor.u32 %v3398_v35, %v2884_v34  ;;  %v2406_v34 = vld [vmem:[#allocation2 + $0x1b8] sm:$0xf0] }
  0xb0   :  { %v2533_v53 = vor.u32 %v3310_v40, %v2532_v36  ;;  %v3238_v29 = vld [vmem:[#allocation2 + $0x74] sm:$0xf0]  ;;  %v3402_v35 = vld [vmem:[#allocation2 + $0x59c] sm:$0xf] }
  0xb1   :  { %1618 = vmatmul.bf16.vlgmr.msrb.gmra.mxu1 %v3571_v58  ;;  %1665 = vmatpush.bf16.msrb.mxu0 %v2849_v37  ;;  %v3390_v37 = vld [vmem:[#allocation2 + $0x534] sm:$0xf0]  ;;  %v2918_v36 = vld [vmem:[#allocation2 + $0x5b8] sm:$0xf0] }
  0xb2   :  { %1680 = vmatpush.bf16.msra.mxu1 %v3041_v41  ;;  %1644 = vmatmul.bf16.vlgmr.msrb.gmra.mxu2 %v3573_v59  ;;  %v3044_v41 = vld [vmem:[#allocation2 + $0x698] sm:$0xf]  ;;  %v2853_v0 = vor.u32 %v3390_v37, %v2852_v50  ;;  %v2374_v50 = vld [vmem:[#allocation2 + $0x178] sm:$0xf0] }
  0xb3   :  { %1701 = vmatpush.bf16.msra.mxu2 %v2693_v44  ;;  %v3262_v44 = vld [vmem:[#allocation2 + $0x134] sm:$0xf0]  ;;  %1715 = vmatpush.bf16.msrb.mxu3 %v2917_v31  ;;  %v3045_v49 = vor.u32 %v3438_v42, %v3044_v41  ;;  %v2245_v42 = vor.u32 %v3238_v29, %v2244_v28  ;;  %v2822_v22 = vld [vmem:[#allocation2 + $0x4f8] sm:$0xf0]  ;;  %v264_v29 = vperm.slane %v3608_v45, 1 }
  0xb4   :  { %v3366_v40 = vld [vmem:[#allocation2 + $0x474] sm:$0xf0]  ;;  %v2825_v28 = vor.u32 %v3378_v21, %v2822_v22 }
  0xb5   :  { %1666 = vmatpush.bf16.msrb.mxu0 %v2817_v3  ;;  %v2820_v3 = vld [vmem:[#allocation2 + $0x4d8] sm:$0xf] }
  0xb6   :  { %1681 = vmatpush.bf16.msra.mxu1 %v3009_v54  ;;  %v2341_v54 = vor.u32 %v3262_v44, %v2340_v43  ;;  %v2821_v15 = vor.u32 %v3382_v4, %v2820_v3  ;;  %v2212_v43 = vld [vmem:[#allocation2 + $0x18] sm:$0xf] }
  0xb7   :  { %1702 = vmatpush.bf16.msra.mxu2 %v2661_v57  ;;  %v263_v57 = vperm.slane %v3608_v45, 0  ;;  %1716 = vmatpush.bf16.msrb.mxu3 %v2885_v48  ;;  %v3230_v48 = vld [vmem:[#allocation2 + $0x34] sm:$0xf0] }
  0xb8   :  { %v1398_v63 = vpop.f32.mrf.mxu1  ;;  %v2724_v56 = vld [vmem:[#allocation2 + $0x418] sm:$0xf]  ;;  %v2213_v60 = vor.u32 %v3230_v48, %v2212_v43 }
  0xb9   :  { %1667 = vmatpush.bf16.msrb.mxu0 %v2785_v18  ;;  %v1385_v2 = vpop.f32.mrf.mxu0  ;;  %v2950_v18 = vld [vmem:[#allocation2 + $0x5f8] sm:$0xf0] }
  0xba   :  { %1682 = vmatpush.bf16.msra.mxu1 %v2977_v7  ;;  %v2309_v7 = vor.u32 %v3254_v62, %v2308_v61  ;;  %v1386_v8 = vadd.f32 %v1385_v2, %v263_v57  ;;  %v2953_v26 = vor.u32 %v3410_v17, %v2950_v18  ;;  %v3358_v57 = vld [vmem:[#allocation2 + $0x434] sm:$0xf0]  ;;  %v3046_v2 = vld [vmem:[#allocation2 + $0x6b8] sm:$0xf0] }
  0xbb   :  { %1703 = vmatpush.bf16.msra.mxu2 %v2629_v11  ;;  %v3422_v11 = vld [vmem:[#allocation2 + $0x634] sm:$0xf0]  ;;  %1717 = vmatpush.bf16.msrb.mxu3 %v2853_v0  ;;  %v3258_v0 = vld [vmem:[#allocation2 + $0x11c] sm:$0xf]  ;;  %v2725_v4 = vor.u32 %v3358_v57, %v2724_v56 }
  0xbc   :  { %v1399_v19 = vadd.f32 %v1398_v63, %v1386_v8  ;;  %v2981_v20 = vor.u32 %v3422_v11, %v2980_v10  ;;  %v3338_v10 = vld [vmem:[#allocation2 + $0x39c] sm:$0xf] }
  0xbd   :  { %1668 = vmatpush.bf16.msrb.mxu0 %v2753_v30  ;;  %v1411_v27 = vpop.f32.mrf.mxu2  ;;  %v3274_v30 = vld [vmem:[#allocation2 + $0x19c] sm:$0xf] }
  0xbe   :  { %1688 = vmatpush.bf16.msrb.mxu1 %v2437_v12  ;;  %v2276_v12 = vld [vmem:[#allocation2 + $0x98] sm:$0xf]  ;;  %v1412_v32 = vadd.f32 %v1411_v27, %v1399_v19  ;;  %v2409_v44 = vor.u32 %v3274_v30, %v2406_v34  ;;  %v2662_v11 = vld [vmem:[#allocation2 + $0x3b8] sm:$0xf0] }
  0xbf   :  { %1704 = vmatpush.bf16.msra.mxu2 %v2597_v24  ;;  %v2277_v24 = vor.u32 %v3246_v13, %v2276_v12  ;;  %1718 = vmatpush.bf16.msrb.mxu3 %v2821_v15  ;;  %v3426_v17 = vld [vmem:[#allocation2 + $0x65c] sm:$0xf]  ;;  %v2665_v19 = vor.u32 %v3338_v10, %v2662_v11 }
  0xc0   :  { %v1400_v31 = vpop.f32.mrf.mxu1  ;;  %v3014_v18 = vld [vmem:[#allocation2 + $0x678] sm:$0xf0] }
  0xc1   :  { %3055 = vmatmul.msk.bf16.vlgmr.msra.gmra.mxu1 %vm1372_vm0, %v3580_v47  ;;  %1669 = vmatpush.bf16.msrb.mxu0 %v2721_v46  ;;  %v1387_v41 = vpop.f32.mrf.mxu0  ;;  %v2921_v46 = vor.u32 %v3402_v35, %v2918_v36  ;;  %v3418_v30 = vld [vmem:[#allocation2 + $0x61c] sm:$0xf] }
  0xc2   :  { %1689 = vmatpush.bf16.msrb.mxu1 %v2405_v25  ;;  %v2441_v25 = vor.u32 %v3282_v14, %v2438_v16  ;;  %v2345_v14 = vor.u32 %v3258_v0, %v2342_v5  ;;  %v3250_v16 = vld [vmem:[#allocation2 + $0xdc] sm:$0xf] }
  0xc3   :  { %1705 = vmatpush.bf16.msra.mxu2 %v2565_v38  ;;  %v3614_v38 = vpop.f32.mrf.mxu3  ;;  %1719 = vmatpush.bf16.msrb.mxu3 %v2789_v33  ;;  %v2982_v31 = vld [vmem:[#allocation2 + $0x638] sm:$0xf0] }
  0xc4   :  { %1670 = vmatmul.bf16.vlgmr.msrb.gmra.mxu0 %v3571_v58  ;;  %v2278_v33 = vld [vmem:[#allocation2 + $0xb8] sm:$0xf0]  ;;  %v1438_v48 = vadd.f32 %v3614_v38, %v264_v29 }
  0xc5   :  { %1732 = vmatpush.bf16.msra.mxu0 %v3045_v49  ;;  %v3266_v49 = vld [vmem:[#allocation2 + $0x15c] sm:$0xf]  ;;  %v1413_v63 = vpop.f32.mrf.mxu2 }
  0xc6   :  { %1690 = vmatpush.bf16.msrb.mxu1 %v2373_v39  ;;  %v2756_v39 = vld [vmem:[#allocation2 + $0x458] sm:$0xf]  ;;  %v2377_v61 = vor.u32 %v3266_v49, %v2374_v50  ;;  %v3370_v34 = vld [vmem:[#allocation2 + $0x49c] sm:$0xf] }
  0xc7   :  { %1706 = vmatpush.bf16.msra.mxu2 %v2533_v53  ;;  %v2757_v37 = vor.u32 %v3366_v40, %v2756_v39  ;;  %v2886_v53 = vld [vmem:[#allocation2 + $0x578] sm:$0xf0] }
  0xc8   :  { %v2889_v62 = vor.u32 %v3394_v51, %v2886_v53  ;;  %v1424_v9 = vpop.f32.mrf.mxu1  ;;  %v2790_v35 = vld [vmem:[#allocation2 + $0x4b8] sm:$0xf0] }
  0xc9   :  { %1733 = vmatpush.bf16.msra.mxu0 %v3013_v1  ;;  %v3434_v1 = vld [vmem:[#allocation2 + $0x69c] sm:$0xf]  ;;  %1720 = vmatpush.bf16.msrb.mxu3 %v2757_v37  ;;  %v3617_v12 = vadd.f32 %v1424_v9, %v1412_v32 }
  0xca   :  { %1691 = vmatpush.bf16.msrb.mxu1 %v2341_v54  ;;  %v3346_v54 = vld [vmem:[#allocation2 + $0x3dc] sm:$0xf]  ;;  %v3049_v13 = vor.u32 %v3434_v1, %v3046_v2 }
  0xcb   :  { %1707 = vmatpush.bf16.msra.mxu2 %v2501_v6  ;;  %v2697_v3 = vor.u32 %v3346_v54, %v2694_v55  ;;  %v3386_v6 = vld [vmem:[#allocation2 + $0x51c] sm:$0xf]  ;;  %v1439_v8 = vpop.f32.mrf.mxu3 }
  0xcc   :  { %v3322_v39 = vld [vmem:[#allocation2 + $0x31c] sm:$0xf] }
  0xcd   :  { %1734 = vmatpush.bf16.msra.mxu0 %v2981_v20  ;;  %1721 = vmatpush.bf16.msrb.mxu3 %v2725_v4  ;;  %v2310_v20 = vld [vmem:[#allocation2 + $0xf8] sm:$0xf0]  ;;  %v1476_v36 = vpop.f32.mrf.mxu2 }
  0xce   :  { %1692 = vmatpush.bf16.msrb.mxu1 %v2309_v7  ;;  %v2854_v7 = vld [vmem:[#allocation2 + $0x538] sm:$0xf0]  ;;  %v2313_v27 = vor.u32 %v3250_v16, %v2310_v20 }
  0xcf   :  { %1708 = vmatpush.bf16.msra.mxu2 %v2469_v23  ;;  %v2857_v15 = vor.u32 %v3386_v6, %v2854_v7  ;;  %v3330_v23 = vld [vmem:[#allocation2 + $0x35c] sm:$0xf] }
  0xd0   :  { %1722 = vmatmul.bf16.vlgmr.msrb.gmra.mxu3 %v3571_v58  ;;  %v2598_v40 = vld [vmem:[#allocation2 + $0x338] sm:$0xf0]  ;;  %v1426_v41 = vpop.f32.mrf.mxu1 }
  0xd1   :  { %1740 = vmatpush.bf16.msrb.mxu0 %v2441_v25  ;;  %1784 = vmatpush.bf16.msra.mxu3 %v3049_v13  ;;  %v3242_v25 = vld [vmem:[#allocation2 + $0x9c] sm:$0xf]  ;;  %v2601_v49 = vor.u32 %v3322_v39, %v2598_v40  ;;  %v265_v13 = vperm.slane %v3608_v45, 2 }
  0xd2   :  { %1693 = vmatpush.bf16.msrb.mxu1 %v2277_v24  ;;  %1709 = vmatmul.bf16.vlgmr.msra.gmra.mxu2 %v3569_v52  ;;  %v2630_v24 = vld [vmem:[#allocation2 + $0x378] sm:$0xf0]  ;;  %v2281_v43 = vor.u32 %v3242_v25, %v2278_v33  ;;  %v266_v33 = vperm.slane %v3608_v45, 3 }
  0xd3   :  { %1766 = vmatpush.bf16.msrb.mxu2 %v2953_v26  ;;  %v3017_v26 = vor.u32 %v3426_v17, %v3014_v18  ;;  %v2633_v32 = vor.u32 %v3330_v23, %v2630_v24  ;;  %v2246_v50 = vld [vmem:[#allocation2 + $0x78] sm:$0xf0]  ;;  %v1489_v9 = vpop.f32.mrf.mxu3 }
  0xd4   :  { %3056 = vmatmul.msk.bf16.vlgmr.msra.gmra.mxu0 %vm1372_vm0, %v3580_v47  ;;  %v3362_v37 = vld [vmem:[#allocation2 + $0x45c] sm:$0xf] }
  0xd5   :  { %1741 = vmatpush.bf16.msrb.mxu0 %v2409_v44  ;;  %1785 = vmatpush.bf16.msra.mxu3 %v3017_v26  ;;  %v2793_v44 = vor.u32 %v3370_v34, %v2790_v35  ;;  %v2758_v51 = vld [vmem:[#allocation2 + $0x478] sm:$0xf0]  ;;  %v1450_v55 = vpop.f32.mrf.mxu0  ;;  %v1478_v1 = vpop.f32.mrf.mxu2 }
  0xd6   :  { %1694 = vmatpush.bf16.msrb.mxu1 %v2245_v42  ;;  %v2985_v42 = vor.u32 %v3418_v30, %v2982_v31  ;;  %v3314_v53 = vld [vmem:[#allocation2 + $0x2dc] sm:$0xf]  ;;  %v2761_v57 = vor.u32 %v3362_v37, %v2758_v51  ;;  %v3116_v51 = vld [vmem:[%s3898_s3 + $0x70] sm:$0xf]  ;;  %v3110_v1 = vld [vmem:[%s3898_s3 + $0x68] sm:$0xf0] }
  0xd7   :  { %1767 = vmatpush.bf16.msrb.mxu2 %v2921_v46  ;;  %v3234_v46 = vld [vmem:[#allocation2 + $0x5c] sm:$0xf] }
  0xd8   :  { %v2566_v54 = vld [vmem:[#allocation2 + $0x2f8] sm:$0xf0]  ;;  %v2249_v56 = vor.u32 %v3234_v46, %v2246_v50 }
  0xd9   :  { %1742 = vmatpush.bf16.msrb.mxu0 %v2377_v61  ;;  %1786 = vmatpush.bf16.msra.mxu3 %v2985_v42  ;;  %v1451_v61 = vadd.f32 %v1450_v55, %v1438_v48  ;;  %v2214_v63 = vld [vmem:[#allocation2 + $0x38] sm:$0xf0]  ;;  %v3453_v55 = vld [vmem:[%s3898_s3 + $0x74] sm:$0xf] }
  0xda   :  { %1695 = vmatpush.bf16.msrb.mxu1 %v2213_v60  ;;  %v3226_v60 = vld [vmem:[#allocation2 + $0x1c] sm:$0xf] }
  0xdb   :  { %1768 = vmatpush.bf16.msrb.mxu2 %v2889_v62  ;;  %v2569_v62 = vor.u32 %v3314_v53, %v2566_v54  ;;  %v3354_v0 = vld [vmem:[#allocation2 + $0x41c] sm:$0xf]  ;;  %v2217_v4 = vor.u32 %v3226_v60, %v2214_v63  ;;  %v1491_v21 = vpop.f32.mrf.mxu3  ;;  %v3454_v53 = vld [vmem:[%s3898_s3 + $0x74] sm:$0xf0]  ;;  %v3452_v63 = vld [vmem:[%s3898_s3 + $0x64] sm:$0xf0] }
  0xdc   :  { %v2726_v38 = vld [vmem:[#allocation2 + $0x438] sm:$0xf0]  ;;  %v3117_v54 = vor.u32 %v3454_v53, %v3116_v51  ;;  %v3084_v21 = vld [vmem:[%s3898_s3 + $0x30] sm:$0xf]  ;;  %v3172_v51 = vld [vmem:[%s3898_s3 + $0xe0] sm:$0xf] }
  0xdd   :  { %1696 = vmatmul.bf16.vlgmr.msrb.gmra.mxu1 %v3573_v59  ;;  %1743 = vmatpush.bf16.msrb.mxu0 %v2345_v14  ;;  %v3306_v2 = vld [vmem:[#allocation2 + $0x29c] sm:$0xf]  ;;  %v2729_v5 = vor.u32 %v3354_v0, %v2726_v38  ;;  %v1452_v10 = vpop.f32.mrf.mxu0  ;;  %v3451_v0 = vld [vmem:[%s3898_s3 + $0x64] sm:$0xf]  ;;  %v3468_v53 = vld [vmem:[%s3898_s3 + $0xe4] sm:$0xf0] }
  0xde   :  { %1753 = vmatpush.bf16.msra.mxu1 %v2697_v3  ;;  %v2534_v3 = vld [vmem:[#allocation2 + $0x2b8] sm:$0xf0]  ;;  %2006 = vmatpush.bf16.msrb.mxu3 %v3117_v54  ;;  %v3448_v10 = vld [vmem:[%s3898_s3 + $0x44] sm:$0xf0]  ;;  %v3467_v54 = vld [vmem:[%s3898_s3 + $0xe4] sm:$0xf] }
  0xdf   :  { %1769 = vmatpush.bf16.msrb.mxu2 %v2857_v15  ;;  %v2537_v6 = vor.u32 %v3306_v2, %v2534_v3  ;;  %v3298_v7 = vld [vmem:[#allocation2 + $0x25c] sm:$0xf]  ;;  %v3113_v2 = vor.u32 %v3451_v0, %v3110_v1  ;;  %v3439_v0 = vld [vmem:[%s3898_s3 + $0x4] sm:$0xf] }
  0xe0   :  { %v2502_v8 = vld [vmem:[#allocation2 + $0x278] sm:$0xf0]  ;;  %3057 = vmatmul.msk.bf16.vlgmr.msra.gmra.mxu3 %vm1372_vm0, %v3580_v47 }
  0xe1   :  { %1744 = vmatpush.bf16.msrb.mxu0 %v2313_v27  ;;  %v2505_v14 = vor.u32 %v3298_v7, %v2502_v8  ;;  %v3290_v16 = vld [vmem:[#allocation2 + $0x21c] sm:$0xf] }
  0xe2   :  { %1754 = vmatpush.bf16.msra.mxu1 %v2665_v19  ;;  %v1463_v11 = vpop.f32.mrf.mxu1  ;;  %v2470_v17 = vld [vmem:[#allocation2 + $0x238] sm:$0xf0]  ;;  %v1490_v19 = vadd.f32 %v1489_v9, %v265_v13  ;;  %v3092_v9 = vld [vmem:[%s3898_s3 + $0x40] sm:$0xf]  ;;  %v3447_v13 = vld [vmem:[%s3898_s3 + $0x44] sm:$0xf] }
  0xe3   :  { %1770 = vmatpush.bf16.msrb.mxu2 %v2825_v28  ;;  %v1464_v15 = vadd.f32 %v1463_v11, %v1451_v61  ;;  %v2473_v20 = vor.u32 %v3290_v16, %v2470_v17  ;;  %v3102_v8 = vld [vmem:[%s3898_s3 + $0x58] sm:$0xf0]  ;;  %v3093_v17 = vor.u32 %v3448_v10, %v3092_v9 }
  0xe5   :  { %1745 = vmatpush.bf16.msrb.mxu0 %v2281_v43  ;;  %v1477_v18 = vadd.f32 %v1476_v36, %v1464_v15 }
  0xe6   :  { %1755 = vmatpush.bf16.msra.mxu1 %v2633_v32 }
  0xe7   :  { %1771 = vmatpush.bf16.msrb.mxu2 %v2793_v44  ;;  %v1793_v44 = vmax.f32 %v1477_v18, 0.0 }
  0xe9   :  { %1746 = vmatpush.bf16.msrb.mxu0 %v2249_v56  ;;  %v1502_v22 = vpop.f32.mrf.mxu2  ;;  %v3118_v56 = vld [vmem:[%s3898_s3 + $0x78] sm:$0xf0] }
  0xea   :  { %1756 = vmatpush.bf16.msra.mxu1 %v2601_v49  ;;  %v1465_v23 = vpop.f32.mrf.mxu1  ;;  %v1503_v24 = vadd.f32 %v1502_v22, %v1490_v19  ;;  %v3446_v22 = vld [vmem:[%s3898_s3 + $0x34] sm:$0xf0] }
  0xeb   :  { %1772 = vmatpush.bf16.msrb.mxu2 %v2761_v57  ;;  %v3121_v57 = vor.u32 %v3453_v55, %v3118_v56  ;;  %v3445_v23 = vld [vmem:[%s3898_s3 + $0x34] sm:$0xf]  ;;  %v3173_v55 = vor.u32 %v3468_v53, %v3172_v51  ;;  %v3174_v56 = vld [vmem:[%s3898_s3 + $0xe8] sm:$0xf0]  ;;  %v3124_v53 = vld [vmem:[%s3898_s3 + $0x80] sm:$0xf] }
  0xed   :  { %1747 = vmatpush.bf16.msrb.mxu0 %v2217_v4  ;;  %v3100_v4 = vld [vmem:[%s3898_s3 + $0x50] sm:$0xf] }
  0xee   :  { %1757 = vmatpush.bf16.msra.mxu1 %v2569_v62  ;;  %v3108_v62 = vld [vmem:[%s3898_s3 + $0x60] sm:$0xf] }
  0xef   :  { %1773 = vmatpush.bf16.msrb.mxu2 %v2729_v5  ;;  %v3109_v38 = vor.u32 %v3452_v63, %v3108_v62  ;;  %v3450_v5 = vld [vmem:[%s3898_s3 + $0x54] sm:$0xf0]  ;;  %v3177_v62 = vor.u32 %v3467_v54, %v3174_v56  ;;  %v3456_v54 = vld [vmem:[%s3898_s3 + $0x84] sm:$0xf0] }
  0xf0   :  { %1748 = vmatmul.bf16.vlgmr.msrb.gmra.mxu0 %v3573_v59  ;;  %v1792_v59 = vmax.f32 %v3617_v12, 0.0  ;;  %v3101_v7 = vor.u32 %v3450_v5, %v3100_v4  ;;  %v3466_v4 = vld [vmem:[%s3898_s3 + $0xd4] sm:$0xf0] }
  0xf1   :  { %v1504_v47 = vpop.f32.mrf.mxu2  ;;  %v1541_v31 = vpop.f32.mrf.mxu3  ;;  %2007 = vmatpush.bf16.msrb.mxu3 %v3109_v38  ;;  %v3062_v38 = vld [vmem:[%s3898_s3 + $0x8] sm:$0xf0] }
  0xf2   :  { %1758 = vmatpush.bf16.msra.mxu1 %v2537_v6  ;;  %1774 = vmatmul.bf16.vlgmr.msrb.gmra.mxu2 %v3571_v58  ;;  %v1528_v25 = vpop.f32.mrf.mxu1  ;;  %v1542_v35 = vadd.f32 %v1541_v31, %v266_v33  ;;  %v3449_v6 = vld [vmem:[%s3898_s3 + $0x54] sm:$0xf]  ;;  %v3086_v47 = vld [vmem:[%s3898_s3 + $0x38] sm:$0xf0]  ;;  %v3180_v33 = vld [vmem:[%s3898_s3 + $0xf0] sm:$0xf] }
  0xf3   :  { %v3105_v11 = vor.u32 %v3449_v6, %v3102_v8  ;;  %v3166_v8 = vld [vmem:[%s3898_s3 + $0xd8] sm:$0xf0] }
  0xf5   :  { %v1515_v26 = vpop.f32.mrf.mxu0  ;;  %2008 = vmatpush.bf16.msrb.mxu3 %v3101_v7  ;;  %v3465_v7 = vld [vmem:[%s3898_s3 + $0xd4] sm:$0xf] }
  0xf6   :  { %1759 = vmatpush.bf16.msra.mxu1 %v2505_v14  ;;  %v1516_v27 = vadd.f32 %v1515_v26, %v1503_v24  ;;  %v3094_v14 = vld [vmem:[%s3898_s3 + $0x48] sm:$0xf0]  ;;  %v3085_v24 = vor.u32 %v3446_v22, %v3084_v21  ;;  %v3076_v26 = vld [vmem:[%s3898_s3 + $0x20] sm:$0xf]  ;;  %v3169_v9 = vor.u32 %v3465_v7, %v3166_v8  ;;  %v3148_v21 = vld [vmem:[%s3898_s3 + $0xb0] sm:$0xf] }
  0xf7   :  { %v3097_v18 = vor.u32 %v3447_v13, %v3094_v14  ;;  %v3464_v13 = vld [vmem:[%s3898_s3 + $0xc4] sm:$0xf0]  ;;  %v3463_v14 = vld [vmem:[%s3898_s3 + $0xc4] sm:$0xf]  ;;  %v3462_v22 = vld [vmem:[%s3898_s3 + $0xb4] sm:$0xf0] }
  0xf8   :  { %v1529_v28 = vadd.f32 %v1528_v25, %v1516_v27  ;;  %v3089_v25 = vor.u32 %v3445_v23, %v3086_v47  ;;  %v3444_v27 = vld [vmem:[%s3898_s3 + $0x24] sm:$0xf0]  ;;  %v3461_v23 = vld [vmem:[%s3898_s3 + $0xb4] sm:$0xf]  ;;  %v3150_v47 = vld [vmem:[%s3898_s3 + $0xb8] sm:$0xf0] }
  0xf9   :  { %v1543_v34 = vpop.f32.mrf.mxu3  ;;  %2009 = vmatpush.bf16.msrb.mxu3 %v3093_v17  ;;  %v3158_v17 = vld [vmem:[%s3898_s3 + $0xc8] sm:$0xf0] }
  0xfa   :  { %1760 = vmatpush.bf16.msra.mxu1 %v2473_v20  ;;  %v1530_v29 = vpop.f32.mrf.mxu1  ;;  %v1794_v58 = vmax.f32 %v1529_v28, 0.0  ;;  %v3443_v28 = vld [vmem:[%s3898_s3 + $0x24] sm:$0xf]  ;;  %v3470_v34 = vld [vmem:[%s3898_s3 + $0xf4] sm:$0xf0] }
  0xfc   :  { %v3632_v30 = vmax.f32 %v1792_v59, %v1794_v58  ;;  %v3077_v59 = vor.u32 %v3444_v27, %v3076_v26  ;;  %v3078_v58 = vld [vmem:[%s3898_s3 + $0x28] sm:$0xf0]  ;;  %v269_v27 = vperm.slane %v3608_v45, 6 }
  0xfd   :  { %1761 = vmatmul.bf16.vlgmr.msra.gmra.mxu1 %v3569_v52  ;;  %v1517_v32 = vpop.f32.mrf.mxu0  ;;  %2010 = vmatpush.bf16.msrb.mxu3 %v3085_v24  ;;  %v3149_v24 = vor.u32 %v3462_v22, %v3148_v21 }
  0xfe   :  { %2032 = vmatpush.bf16.msrb.mxu1 %v3121_v57  ;;  %v3081_v32 = vor.u32 %v3443_v28, %v3078_v58  ;;  %v3060_v57 = vld [vmem:[%s3898_s3] sm:$0xf]  ;;  %v3459_v58 = vld [vmem:[%s3898_s3 + $0xa4] sm:$0xf] }
 0x101   :  { %2011 = vmatpush.bf16.msrb.mxu3 %v3077_v59  ;;  %v3460_v59 = vld [vmem:[%s3898_s3 + $0xa4] sm:$0xf0] }
 0x102   :  { %2033 = vmatpush.bf16.msrb.mxu1 %v3113_v2  ;;  %v3065_v2 = vor.u32 %v3439_v0, %v3062_v38 }
 0x105   :  { %v1580_v39 = vpop.f32.mrf.mxu0 }
 0x106   :  { %2034 = vmatpush.bf16.msrb.mxu1 %v3105_v11  ;;  %v3156_v11 = vld [vmem:[%s3898_s3 + $0xc0] sm:$0xf] }
 0x109   :  { %v1567_v36 = vpop.f32.mrf.mxu2 }
 0x10a   :  { %2035 = vmatpush.bf16.msrb.mxu1 %v3097_v18  ;;  %v3161_v18 = vor.u32 %v3463_v14, %v3158_v17 }
 0x10d   :  { %v1582_v48 = vpop.f32.mrf.mxu0 }
 0x10e   :  { %v1554_v52 = vpop.f32.mrf.mxu1  ;;  %2036 = vmatpush.bf16.msrb.mxu1 %v3089_v25  ;;  %v3153_v25 = vor.u32 %v3461_v23, %v3150_v47 }
 0x10f   :  { %v1555_v40 = vadd.f32 %v1554_v52, %v1542_v35  ;;  %v3469_v35 = vld [vmem:[%s3898_s3 + $0xf4] sm:$0xf]  ;;  %v3182_v52 = vld [vmem:[%s3898_s3 + $0xf8] sm:$0xf0] }
 0x111   :  { %v1568_v41 = vadd.f32 %v1567_v36, %v1555_v40  ;;  %v1569_v43 = vpop.f32.mrf.mxu2  ;;  %v3639_v37 = vpop.f32.mrf.mxu3  ;;  %v3068_v40 = vld [vmem:[%s3898_s3 + $0x10] sm:$0xf] }
 0x112   :  { %2037 = vmatpush.bf16.msrb.mxu1 %v3081_v32 }
 0x113   :  { %v1581_v42 = vadd.f32 %v1580_v39, %v1568_v41  ;;  %v3181_v39 = vor.u32 %v3470_v34, %v3180_v33  ;;  %v3442_v41 = vld [vmem:[%s3898_s3 + $0x14] sm:$0xf0]  ;;  %v3142_v34 = vld [vmem:[%s3898_s3 + $0xa8] sm:$0xf0] }
 0x114   :  { %v3069_v43 = vor.u32 %v3442_v41, %v3068_v40  ;;  %v3132_v40 = vld [vmem:[%s3898_s3 + $0x90] sm:$0xf]  ;;  %v3458_v41 = vld [vmem:[%s3898_s3 + $0x94] sm:$0xf0] }
 0x115   :  { %v1795_v46 = vmax.f32 %v1581_v42, 0.0  ;;  %v3185_v42 = vor.u32 %v3469_v35, %v3182_v52  ;;  %2019 = vmatpush.bf16.msra.mxu0 %v3181_v39  ;;  %v3145_v35 = vor.u32 %v3459_v58, %v3142_v34  ;;  %v3473_v58 = vld [vmem:[%s3900_s5 + $0x10] sm:$0xff] }
 0x116   :  { %v1556_v12 = vpop.f32.mrf.mxu1  ;;  %2012 = vmatpush.bf16.msrb.mxu3 %v3069_v43  ;;  %v3133_v43 = vor.u32 %v3458_v41, %v3132_v40 }
 0x117   :  { %v3635_v49 = vmax.f32 %v1793_v44, %v1795_v46  ;;  %v3441_v44 = vld [vmem:[%s3898_s3 + $0x14] sm:$0xf]  ;;  %v3070_v46 = vld [vmem:[%s3898_s3 + $0x18] sm:$0xf0]  ;;  %2045 = vmatpush.bf16.msra.mxu2 %v3185_v42 }
 0x118   :  { %v3073_v12 = vor.u32 %v3441_v44, %v3070_v46  ;;  %v3457_v42 = vld [vmem:[%s3898_s3 + $0x94] sm:$0xf] }
 0x119   :  { %v3637_v50 = vpop.f32.mrf.mxu2  ;;  %v1595_v3 = vpop.f32.mrf.mxu3  ;;  %2020 = vmatpush.bf16.msra.mxu0 %v3173_v55  ;;  %v3455_v55 = vld [vmem:[%s3898_s3 + $0x84] sm:$0xf] }
 0x11a   :  { %2038 = vmatpush.bf16.msrb.mxu1 %v3073_v12  ;;  %v3164_v3 = vld [vmem:[%s3898_s3 + $0xd0] sm:$0xf] }
 0x11b   :  { %2046 = vmatpush.bf16.msra.mxu2 %v3177_v62  ;;  %v3165_v6 = vor.u32 %v3466_v4, %v3164_v3 }
 0x11d   :  { %2021 = vmatpush.bf16.msra.mxu0 %v3165_v6  ;;  %v268_v6 = vperm.slane %v3608_v45, 5 }
 0x11e   :  { %2039 = vmatpush.bf16.msrb.mxu1 %v3065_v2  ;;  %v3478_v2 = vld [vmem:[%s3900_s5 + $0x38] sm:$0xff] }
 0x11f   :  { %2047 = vmatpush.bf16.msra.mxu2 %v3169_v9 }
 0x121   :  { %v3653_v60 = vpop.f32.mrf.mxu0  ;;  %v1634_v61 = vpop.f32.mrf.mxu2 }
 0x122   :  { %v3440_v61 = vld [vmem:[%s3898_s3 + $0x4] sm:$0xf0] }
 0x123   :  { %v3061_v63 = vor.u32 %v3440_v61, %v3060_v57  ;;  %2048 = vmatpush.bf16.msra.mxu2 %v3161_v18  ;;  %v3125_v61 = vor.u32 %v3456_v54, %v3124_v53 }
 0x125   :  { %2013 = vmatpush.bf16.msrb.mxu3 %v3061_v63 }
 0x127   :  { %2049 = vmatpush.bf16.msra.mxu2 %v3153_v25 }
 0x129   :  { %v1608_v15 = vpop.f32.mrf.mxu0  ;;  %2142 = vmatpush.bf16.msra.mxu3 %v3478_v2 }
 0x12a   :  { %v3157_v15 = vor.u32 %v3464_v13, %v3156_v11  ;;  %v270_v11 = vperm.slane %v3608_v45, 7 }
 0x12b   :  { %2050 = vmatpush.bf16.msra.mxu2 %v3145_v35 }
 0x12c   :  { %2022 = vmatpush.bf16.msra.mxu0 %v3157_v15 }
 0x12e   :  { %v3691_v16 = vpop.f32.mrf.mxu1 }
 0x130   :  { %2023 = vmatpush.bf16.msra.mxu0 %v3149_v24 }
 0x131   :  { %v3730_v36 = vpop.f32.mrf.mxu3 }
 0x135   :  { %v3693_v19 = vpop.f32.mrf.mxu2 }
 0x136   :  { %v1621_v20 = vpop.f32.mrf.mxu1 }
 0x137   :  { %v267_v20 = vperm.slane %v3608_v45, 4 }
 0x139   :  { %v1660_v5 = vpop.f32.mrf.mxu3  ;;  %v1594_v26 = vadd.f32 %v3639_v37, %v267_v20 }
 0x13b   :  { %v1607_v39 = vadd.f32 %v3653_v60, %v1594_v26  ;;  %v3134_v60 = vld [vmem:[%s3898_s3 + $0x98] sm:$0xf0] }
 0x13c   :  { %v3137_v44 = vor.u32 %v3457_v42, %v3134_v60 }
 0x13d   :  { %v1647_v29 = vpop.f32.mrf.mxu2  ;;  %v1620_v46 = vadd.f32 %v3691_v16, %v1607_v39  ;;  %v3126_v16 = vld [vmem:[%s3898_s3 + $0x88] sm:$0xf0] }
 0x13e   :  { %v3719_v31 = vpop.f32.mrf.mxu1  ;;  %v3140_v29 = vld [vmem:[%s3898_s3 + $0xa0] sm:$0xf]  ;;  %2051 = vmatpush.bf16.msra.mxu2 %v3137_v44  ;;  %v3129_v63 = vor.u32 %v3455_v55, %v3126_v16 }
 0x13f   :  { %v3141_v37 = vor.u32 %v3460_v59, %v3140_v29  ;;  %v1633_v0 = vadd.f32 %v3637_v50, %v1620_v46  ;;  %v1646_v50 = vadd.f32 %v3693_v19, %v268_v6  ;;  %v3475_v29 = vld [vmem:[%s3900_s5 + $0x20] sm:$0xff] }
 0x140   :  { %v3479_v59 = vld [vmem:[%s3900_s5 + $0x40] sm:$0xff] }
 0x141   :  { %v3747_v48 = vpop.f32.mrf.mxu0  ;;  %2024 = vmatpush.bf16.msra.mxu0 %v3141_v37  ;;  %v1796_v3 = vmax.f32 %v1633_v0, 0.0  ;;  %v1659_v13 = vadd.f32 %v3730_v36, %v1646_v50 }
 0x142   :  { %2052 = vmatpush.bf16.msra.mxu2 %v3129_v63 }
 0x143   :  { %v1672_v18 = vadd.f32 %v3747_v48, %v1659_v13  ;;  %v3477_v48 = vld [vmem:[%s3900_s5 + $0x30] sm:$0xff] }
 0x144   :  { %2143 = vmatpush.bf16.msra.mxu3 %v3477_v48 }
 0x145   :  { %2025 = vmatpush.bf16.msra.mxu0 %v3133_v43 }
 0x146   :  { %v1686_v1 = vpop.f32.mrf.mxu1 }
 0x149   :  { %v1673_v10 = vpop.f32.mrf.mxu0  ;;  %2026 = vmatpush.bf16.msra.mxu0 %v3125_v61  ;;  %v3483_v61 = vld [vmem:[%s3901_s6] ss:$0 sm:$0xff] }
 0x14d   :  { %2162 = vmatpush.bf16.msrb.mxu0 %v3479_v59 }
 0x151   :  { %v1736_v32 = vpop.f32.mrf.mxu0 }
 0x153   :  { %v1723_v62 = vpop.f32.mrf.mxu3 }
 0x155   :  { %v1710_v28 = vpop.f32.mrf.mxu2 }
 0x159   :  { %v1738_v56 = vpop.f32.mrf.mxu0 }
 0x15a   :  { %v1697_v33 = vpop.f32.mrf.mxu1 }
 0x15b   :  { %v1698_v52 = vadd.f32 %v1697_v33, %v269_v27  ;;  %v1725_v7 = vpop.f32.mrf.mxu3  ;;  %v3471_v33 = vld [vmem:[%s3900_s5] sm:$0xff] }
 0x15d   :  { %v1711_v12 = vadd.f32 %v1710_v28, %v1698_v52  ;;  %v1712_v51 = vpop.f32.mrf.mxu2  ;;  %v1840_v52 = vld [vmem:[%s3899_s4] sm:$0x3] }
 0x15e   :  { %v1842_v40 = vperm.slane %v1840_v52, 0  ;;  %v1843_v43 = vperm.slane %v1840_v52, 1 }
 0x15f   :  { %v1724_v38 = vadd.f32 %v1723_v62, %v1711_v12 }
 0x161   :  { %v1737_v1 = vadd.f32 %v1736_v32, %v1724_v38  ;;  %v3472_v32 = vld [vmem:[%s3900_s5 + $0x8] sm:$0xff] }
 0x162   :  { %v1699_v57 = vpop.f32.mrf.mxu1 }
 0x163   :  { %v1798_v4 = vmax.f32 %v1737_v1, 0.0  ;;  %v1788_v14 = vpop.f32.mrf.mxu3 }
 0x165   :  { %v1802_v5 = vmax.f32 %v1796_v3, %v1798_v4  ;;  %v2168_v4 = vlaneseq }
 0x167   :  { %v1804_v8 = vmax.f32 %v3632_v30, %v1802_v5  ;;  %v1685_v30 = vadd.f32 %v3719_v31, %v1672_v18  ;;  %v3476_v31 = vld [vmem:[%s3900_s5 + $0x28] sm:$0xff]  ;;  %v2169_v7 = vand.u32 127, %v2168_v4 }
 0x168   :  { %2144 = vmatpush.bf16.msra.mxu3 %v3476_v31 }
 0x169   :  { %v1806_v9 = vpack.c.bf16 %v1804_v8, %v1804_v8  ;;  %v1797_v25 = vmax.f32 %v1685_v30, 0.0  ;;  %vm2176_vm2 = vcmp.lt.s32.totalorder %v2169_v7, 5  ;;  %vm2175_vm3 = vcmp.eq.s32.totalorder %v2169_v7, 0 }
 0x16b   :  { %2014 = vmatmul.bf16.vlgmr.msrb.gmra.mxu3 %v1806_v9  ;;  %2040 = vmatmul.bf16.vlgmr.msrb.gmra.mxu1 %v1806_v9  ;;  %v1790_v24 = vpop.f32.mrf.mxu3 }
 0x16c   :  { %2145 = vmatpush.bf16.msra.mxu3 %v3475_v29 }
 0x16d   :  { %v1749_v10 = vpop.f32.mrf.mxu0 }
 0x16e   :  { %v1750_v15 = vadd.f32 %v1749_v10, %v270_v11 }
 0x175   :  { %v1775_v17 = vpop.f32.mrf.mxu2  ;;  %v1751_v20 = vpop.f32.mrf.mxu0 }
 0x17a   :  { %v1762_v21 = vpop.f32.mrf.mxu1 }
 0x17b   :  { %v1763_v22 = vadd.f32 %v1762_v21, %v1750_v15 }
 0x17d   :  { %v1776_v23 = vadd.f32 %v1775_v17, %v1763_v22  ;;  %v1777_v47 = vpop.f32.mrf.mxu2 }
 0x17f   :  { %v1789_v19 = vadd.f32 %v1788_v14, %v1776_v23 }
 0x181   :  { %v1799_v26 = vmax.f32 %v1789_v19, 0.0 }
 0x182   :  { %v1764_v27 = vpop.f32.mrf.mxu1 }
 0x183   :  { %v1803_v45 = vmax.f32 %v1797_v25, %v1799_v26 }
 0x185   :  { %v1805_v36 = vmax.f32 %v3635_v49, %v1803_v45  ;;  %v3474_v49 = vld [vmem:[%s3900_s5 + $0x18] sm:$0xff] }
 0x186   :  { %2146 = vmatpush.bf16.msra.mxu3 %v3474_v49 }
 0x187   :  { %v1807_v28 = vpack.c.bf16 %v1805_v36, %v1805_v36 }
 0x189   :  { %2027 = vmatmul.bf16.vlgmr.msra.gmra.mxu0 %v1807_v28  ;;  %2053 = vmatmul.bf16.vlgmr.msra.gmra.mxu2 %v1807_v28 }
 0x18a   :  { %2147 = vmatpush.bf16.msra.mxu3 %v3473_v58 }
 0x18e   :  { %2148 = vmatpush.bf16.msra.mxu3 %v3472_v32 }
 0x192   :  { %2149 = vmatpush.bf16.msra.mxu3 %v3471_v33 }
 0x1e8   :  { %v2041_v37 = vpop.f32.mrf.mxu1 }
 0x1e9   :  { %v2042_v46 = vadd.f32 %v2041_v37, %v1843_v43 }
 0x1ee   :  { %v2015_v34 = vpop.f32.mrf.mxu3 }
 0x1ef   :  { %v2016_v41 = vadd.f32 %v2015_v34, %v1842_v40 }
 0x1f0   :  { %v2043_v35 = vpop.f32.mrf.mxu1 }
 0x1f6   :  { %v2017_v39 = vpop.f32.mrf.mxu3 }
 0x206   :  { %v2028_v42 = vpop.f32.mrf.mxu0 }
 0x207   :  { %v2029_v60 = vadd.f32 %v2028_v42, %v2016_v41 }
 0x209   :  { %v2058_v44 = vmax.f32 %v2029_v60, 0.0 }
 0x20b   :  { %v2060_v12 = vpack.c.bf16 %v2058_v44, %v2058_v44 }
 0x20c   :  { %v2054_v51 = vpop.f32.mrf.mxu2 }
 0x20d   :  { %v2055_v53 = vadd.f32 %v2054_v51, %v2042_v46  ;;  %2150 = vmatmul.bf16.vlgmr.msra.gmra.mxu3 %v2060_v12 }
 0x20e   :  { %v2030_v54 = vpop.f32.mrf.mxu0 }
 0x20f   :  { %v2059_v55 = vmax.f32 %v2055_v53, 0.0 }
 0x211   :  { %v2061_v56 = vpack.c.bf16 %v2059_v55, %v2059_v55 }
 0x213   :  { %3222 = vmatmul.msk.bf16.vlgmr.msrb.gmra.mxu0 %vm2138_vm1, %v2061_v56 }
 0x214   :  { %v2056_v57 = vpop.f32.mrf.mxu2 }
 0x290   :  { %v2151_v16 = vpop.f32.mrf.mxu3  ;;  %v2164_v62 = vpop.f32.mrf.mxu0 }
 0x291   :  { %v2152_v63 = vadd.f32 %v3483_v61, %v2151_v16 }
 0x293   :  { %v2165_v0 = vadd.f32 %v2164_v62, %v2152_v63 }
 0x295   :  { %v2170_v38 = vsub.f32 0.0, %v2165_v0  ;;  %v2177_v8 = vmax.f32 %v2165_v0, 0.0 }
 0x297   :  { %v2171_v1 = vmul.f32 1.442695, %v2170_v38  ;;  %v2178_v50 = vsel %vm2176_vm2, %v2177_v8, 0.0 }
 0x298   :  { %v2153_v2 = vpop.f32.mrf.mxu3  ;;  %v2166_v3 = vpop.f32.mrf.mxu0 }
 0x299   :  { %3484 = vpow2.f32 %v2171_v1 }
 0x29f   :  { %v3485_v5 = vpop.eup %3484 }
 0x2a0   :  { %v2173_v6 = vadd.f32 1.0, %v3485_v5 }
 0x2a2   :  { %3486 = vrcp.f32 %v2173_v6 }
 0x2a8   :  { %v3487_v9 = vpop.eup %3486 }
 0x2a9   :  { %v2179_v10 = vsel %vm2175_vm3, %v3487_v9, %v2178_v50 }
 0x2aa   :  { %2180 = vst [vmem:[%s3902_s7] sm:$0xff] %v2179_v10 }
 0x2ab   :  { %2185 = vsyncpa [#allocation3], 1 }

</bundles_post_ra>
